<compile_context>
chip_gen: v6e
topology: v6e:2x2x1
jax: 0.10.0
libtpu: 0.0.40
codegen_flags: <defaults>
</compile_context>

<pallas_src>
import numpy as np
import jax
import jax.numpy as jnp
from jax.experimental import pallas as pl
from jax.experimental.pallas import tpu as pltpu


# ----------------------------- host-side helpers ----------------------------- #

def _round_up(x, m):
    return ((x + m - 1) // m) * m


def _vmem_limit_bytes():
    """Generation-aware scoped-VMEM limit (v7x has only 64 MiB physical per core)."""
    cap = 128 * 1024 * 1024
    try:
        info = pltpu.get_tpu_info()
        cap = int(getattr(info, "vmem_capacity_bytes", cap))
    except Exception:
        pass
    return int(min(48 * 1024 * 1024, (cap * 5) // 8))


def _hann_window(win_length):
    # scipy.signal.get_window('hann', win_length, fftbins=True)  (periodic hann)
    n = np.arange(win_length, dtype=np.float64)
    return 0.5 - 0.5 * np.cos(2.0 * np.pi * n / win_length)


def _pad_center(data, size):
    n = data.shape[0]
    lpad = (size - n) // 2
    return np.pad(data, (lpad, size - n - lpad), mode="constant")


def _window_sumsquare(window, n_frames, hop_length, win_length, n_fft):
    # librosa.filters.window_sumsquare (norm=None) for 'hann'
    assert window == "hann", "only 'hann' implemented in this synthetic kernel"
    n = n_fft + hop_length * (n_frames - 1)
    x = np.zeros(n, dtype=np.float32)
    win_sq = _hann_window(win_length) ** 2
    win_sq = _pad_center(win_sq, n_fft).astype(np.float32)
    for i in range(n_frames):
        s = i * hop_length
        x[s:min(n, s + n_fft)] += win_sq[: max(0, min(n_fft, n - s))]
    return x


# ------------------------------ fused Pallas kernel ------------------------------ #

def _fused_stft_istft_pallas(blocks_lo, blocks_hi, fwd_lo, fwd_hi,
                             inv_first, inv_second, shift_mat,
                             corr_lo, corr_hi, cp, tile_t,
                             single_buffer_bases=True):
    """Fused analysis + synthesis.

    blocks_lo/hi : (B, Tpad, H)  f32  non-overlapping signal blocks (frame t = lo_t|hi_t)
    fwd_lo/hi    : (H, 2Cp)      f32  lane-padded windowed-DFT basis, K split in half
    inv_first/second : (2Cp, H)  f32  lane-padded synthesis basis, output split in half
    shift_mat    : (tile_t, tile_t)   sub-diagonal matrix (row r -> row r-1, row 0 -> 0)
    corr_lo/hi   : (Tpad, H)     f32  window-sum / scale correction rows t and t+1

    Returns:
      ft   (B, Tpad, 2Cp) : real in [:Cp], imag in [Cp:] (padding columns are zero)
      comb (B, Tpad, H)   : in-tile overlap-added synthesis blocks
                            comb[t] = ca[t] + cb[t-1] (cb of the previous tile omitted)
    """
    B, Tpad, H = blocks_lo.shape
    two_cp = fwd_lo.shape[1]
    F = 2 * H
    n_t = Tpad // tile_t

    def kernel(blo_ref, bhi_ref, flo_ref, fhi_ref, i1_ref, i2_ref, s_ref,
               clo_ref, chi_ref, ft_ref, comb_ref):
        # analysis: windowed DFT as two half-K matmuls (no gathered overlapping frames)
        ft = (jnp.dot(blo_ref[0], flo_ref[...], preferred_element_type=jnp.float32)
              + jnp.dot(bhi_ref[0], fhi_ref[...], preferred_element_type=jnp.float32))
        ft_ref[0] = ft                              # real in [:cp], imag in [cp:]
        # synthesis: mag*cos(phase) == real, mag*sin(phase) == imag -> use ft directly;
        # window-sum correction applied in-kernel.
        ca = jnp.dot(ft, i1_ref[...], preferred_element_type=jnp.float32) * clo_ref[...]
        cb = jnp.dot(ft, i2_ref[...], preferred_element_type=jnp.float32) * chi_ref[...]
        # intra-tile overlap-add: combined[r] = ca[r] + cb[r-1].  The one-row shift is a
        # matmul with a constant sub-diagonal matrix (its row 0 is zero, so the missing
        # cross-tile term is fixed up cheaply in the wrapper).
        comb_ref[0] = ca + jnp.dot(s_ref[...], cb, preferred_element_type=jnp.float32)

    def _const_spec(shape):
        # grid-invariant operands: fetched once; single-buffer them to free VMEM.
        if single_buffer_bases:
            return pl.BlockSpec(shape, lambda b, i: (0, 0),
                                pipeline_mode=pl.Buffered(1))
        return pl.BlockSpec(shape, lambda b, i: (0, 0))

    flops = 2 * B * Tpad * (2 * F * two_cp + tile_t * H)
    bytes_accessed = 4 * (2 * B * Tpad * H          # blocks (lo + hi)
                          + 2 * Tpad * H            # corr
                          + 4 * H * two_cp          # bases (read once)
                          + tile_t * tile_t         # shift matrix (read once)
                          + B * Tpad * (two_cp + H))  # ft + combined outputs

    return pl.pallas_call(
        kernel,
        out_shape=(jax.ShapeDtypeStruct((B, Tpad, two_cp), jnp.float32),
                   jax.ShapeDtypeStruct((B, Tpad, H), jnp.float32)),
        grid=(B, n_t),
        in_specs=[pl.BlockSpec((1, tile_t, H), lambda b, i: (b, i, 0)),
                  pl.BlockSpec((1, tile_t, H), lambda b, i: (b, i, 0)),
                  _const_spec((H, two_cp)),
                  _const_spec((H, two_cp)),
                  _const_spec((two_cp, H)),
                  _const_spec((two_cp, H)),
                  _const_spec((tile_t, tile_t)),
                  pl.BlockSpec((tile_t, H), lambda b, i: (i, 0)),
                  pl.BlockSpec((tile_t, H), lambda b, i: (i, 0))],
        out_specs=(pl.BlockSpec((1, tile_t, two_cp), lambda b, i: (b, i, 0)),
                   pl.BlockSpec((1, tile_t, H), lambda b, i: (b, i, 0))),
        compiler_params=pltpu.CompilerParams(
            dimension_semantics=("parallel", "parallel"),
            vmem_limit_bytes=_vmem_limit_bytes()),
        cost_estimate=pl.CostEstimate(flops=int(flops), transcendentals=0,
                                      bytes_accessed=int(bytes_accessed)),
    )(blocks_lo, blocks_hi, fwd_lo, fwd_hi, inv_first, inv_second, shift_mat,
      corr_lo, corr_hi)


# --------------------------------- module ----------------------------------- #

class STFTPallas:
    def __init__(self, filter_length=1024, hop_length=512, win_length=None, window="hann"):
        self.filter_length = filter_length
        self.hop_length = hop_length
        self.win_length = win_length if win_length else filter_length
        self.window = window
        self.pad_amount = filter_length // 2
        self.cutoff = filter_length // 2 + 1
        assert filter_length >= self.win_length
        assert hop_length * 2 == filter_length, "restricted to 50% overlap (like the reference)"

        F = filter_length
        H = hop_length
        C = self.cutoff
        Cp = _round_up(C, 128)                       # lane-aligned frequency width
        self.cutoff_padded = Cp

        scale = F / H
        fourier_basis = np.fft.fft(np.eye(F))
        fourier_basis = np.vstack(
            [np.real(fourier_basis[:C, :]), np.imag(fourier_basis[:C, :])])     # (2C, F)

        fft_window = _pad_center(_hann_window(self.win_length), F).astype(np.float32)

        forward_basis = fourier_basis.astype(np.float32) * fft_window[None, :]            # (2C, F)
        inverse_basis = (np.linalg.pinv(scale * fourier_basis).T.astype(np.float32)
                         * fft_window[None, :])                                            # (2C, F)

        # forward basis transposed to (F, 2Cp): real in cols [0,Cp), imag in [Cp,Cp+C);
        # split along the contraction axis F into the two half-frame blocks.
        basis_t = forward_basis.T                                               # (F, 2C)
        basis_t_pad = np.zeros((F, 2 * Cp), np.float32)
        basis_t_pad[:, :C] = basis_t[:, :C]
        basis_t_pad[:, Cp:Cp + C] = basis_t[:, C:]
        self.fwd_lo = jnp.asarray(basis_t_pad[:H])                              # (H, 2Cp)
        self.fwd_hi = jnp.asarray(basis_t_pad[H:])                              # (H, 2Cp)

        # inverse basis rows padded to match the ft layout; split along the output
        # (frame-sample) axis into first/second half for the overlap-add.
        inv_pad = np.zeros((2 * Cp, F), np.float32)
        inv_pad[:C] = inverse_basis[:C]
        inv_pad[Cp:Cp + C] = inverse_basis[C:]
        self.inv_first = jnp.asarray(inv_pad[:, :H])                            # (2Cp, H)
        self.inv_second = jnp.asarray(inv_pad[:, H:])                           # (2Cp, H)

        # TODO(synk): bf16 operands (v5e suggestion) would halve input DMA / basis VMEM
        # but loosen magnitude/phase precision; kept f32 to preserve reference semantics.
        # TODO(synk): for hop_length < 128 the H-wide lanes are sparse; folding to a
        # 2H=F lane layout would make those configs lane-dense.
        self._corr_cache = {}
        self._shift_cache = {}
        self._single_buffer_bases = True     # disabled at runtime if Buffered(1) rejected
        self.magnitude = None
        self.phase = None

    # -------- host-side tiling / correction tables (cached per frame count) -------- #

    def _tiling(self, T):
        H, Cp = self.hop_length, self.cutoff_padded
        n_tiles = -(-T // 512)                       # target ~512 frames per tile
        tile_t = _round_up(-(-T // n_tiles), 8)      # multiple of 8 (sublane)
        # keep the pipelined per-tile working set + single-buffered bases inside budget
        bases = 4 * 4 * H * 2 * Cp
        budget = int(0.6 * _vmem_limit_bytes()) - bases

        def per_tile(t):
            dbl = 4 * t * H + t * 2 * Cp + t * H     # blocks(2)+corr(2), ft, comb
            return 4 * (2 * dbl + t * t)             # double-buffered + shift matrix

        while tile_t > 8 and per_tile(tile_t) > budget:
            tile_t -= 8
        t_pad = -(-T // tile_t) * tile_t
        return tile_t, t_pad

    def _get_corr(self, T, t_pad):
        key = (T, t_pad)
        if key not in self._corr_cache:
            H = self.hop_length
            ws = _window_sumsquare(self.window, T, H, self.win_length, self.filter_length)
            corr = np.ones_like(ws)
            nz = ws > np.finfo(np.float32).tiny
            corr[nz] = 1.0 / ws[nz]
            corr *= float(self.filter_length) / H
            corr2d = corr.reshape(T + 1, H)
            pr = t_pad - T
            corr_lo = np.pad(corr2d[:T], ((0, pr), (0, 0)))          # row t   (first half)
            corr_hi = np.pad(corr2d[1:T + 1], ((0, pr), (0, 0)))     # row t+1 (second half)
            self._corr_cache[key] = (jnp.asarray(corr_lo), jnp.asarray(corr_hi))
        return self._corr_cache[key]

    def _get_shift(self, tile_t):
        if tile_t not in self._shift_cache:
            self._shift_cache[tile_t] = jnp.asarray(np.eye(tile_t, k=-1, dtype=np.float32))
        return self._shift_cache[tile_t]

    # ------------------------------------ forward ------------------------------------ #

    def forward(self, x):
        B, num_samples = x.shape
        F = self.filter_length
        H = self.hop_length
        C = self.cutoff
        Cp = self.cutoff_padded
        pad = self.pad_amount
        x = x.astype(jnp.float32)

        padded = jnp.pad(x, ((0, 0), (pad, pad)), mode="reflect")
        L = padded.shape[1]
        T = (L - F) // H + 1
        tile_t, t_pad = self._tiling(T)
        n_t = t_pad // tile_t

        # 50%-overlap framing without a gather: non-overlapping H-blocks; frame t uses
        # blocks t and t+1.
        # TODO(synk): blocks_lo/hi duplicate the signal in HBM; a manual halo DMA via a
        # pl.ANY input would remove one full-signal copy but needs hand-rolled buffering.
        blocks = padded[:, :(T + 1) * H].reshape(B, T + 1, H)
        blocks_lo = blocks[:, :T]
        blocks_hi = blocks[:, 1:T + 1]
        if t_pad > T:
            zp = ((0, 0), (0, t_pad - T), (0, 0))
            blocks_lo = jnp.pad(blocks_lo, zp)
            blocks_hi = jnp.pad(blocks_hi, zp)
        corr_lo, corr_hi = self._get_corr(T, t_pad)
        shift_mat = self._get_shift(tile_t)

        args = (blocks_lo, blocks_hi, self.fwd_lo, self.fwd_hi,
                self.inv_first, self.inv_second, shift_mat, corr_lo, corr_hi)
        if self._single_buffer_bases:
            try:
                ft, comb = _fused_stft_istft_pallas(*args, Cp, tile_t,
                                                    single_buffer_bases=True)
            except Exception:
                # this JAX build rejects pl.Buffered(1); fall back to default buffering
                self._single_buffer_bases = False
                ft, comb = _fused_stft_istft_pallas(*args, Cp, tile_t,
                                                    single_buffer_bases=False)
        else:
            ft, comb = _fused_stft_istft_pallas(*args, Cp, tile_t,
                                                single_buffer_bases=False)

        # magnitude / phase attributes (torch layout (B, n_freq, n_frames)); derived in
        # plain JAX from the ft slices to avoid an extra Cp-wide kernel output.
        real = ft[:, :T, :C]
        imag = ft[:, :T, Cp:Cp + C]
        # TODO(synk): atan2 stays in JAX glue (tiny elementwise; uneven Mosaic coverage).
        self.magnitude = jnp.transpose(jnp.sqrt(real * real + imag * imag), (0, 2, 1))
        self.phase = jnp.transpose(jnp.arctan2(imag, real), (0, 2, 1))

        # overlap-add: the kernel already produced combined[j] = ca[j] + cb[j-1] within
        # each tile; add the tiny cross-tile boundary terms (last cb of every tile).
        tail_frames = np.arange(1, n_t + 1) * tile_t - 1
        tail_blocks = np.arange(1, n_t + 1) * tile_t
        ft_tail = ft[:, tail_frames]                                   # (B, n_t, 2Cp)
        cb_tail = (jnp.einsum('bnc,ch->bnh', ft_tail, self.inv_second)
                   * corr_hi[tail_frames][None])                       # (B, n_t, H)
        full = jnp.zeros((B, t_pad + 1, H), jnp.float32)
        full = full.at[:, :t_pad].set(comb)
        full = full.at[:, tail_blocks].add(cb_tail)
        inv = full[:, :T + 1].reshape(B, (T + 1) * H)
        return inv[:, pad:pad + num_samples]

    __call__ = forward


# ---------------------------------- main ------------------------------------ #

if __name__ == "__main__":
    key = jax.random.PRNGKey(0)
    B, num_samples = 2, 512
    x = jax.random.normal(key, (B, num_samples), dtype=jnp.float32)

    stft = STFTPallas(filter_length=128, hop_length=64)   # small shapes for the demo
    y = stft(x)
    y = jax.block_until_ready(y)

    assert y.shape == (B, num_samples)
    assert bool(jnp.all(jnp.isfinite(y)))
    # hann / 50% overlap STFT -> iSTFT reconstructs the signal away from the edges.
    # Tolerance allows for the MXU's bf16 operand truncation at default dot precision.
    err = float(jnp.max(jnp.abs(y[:, 64:-64] - x[:, 64:-64])))
    assert err < 5e-2, f"reconstruction error too large: {err}"

    print("KERNEL_OK")
</pallas_src>

<mosaic_0001>
module attributes {stable_mosaic.version = 11 : i64} {
  func.func @kernel(%arg0: i32, %arg1: i32, %arg2: memref<1x16x64xf32, #tpu.memory_space<vmem>>, %arg3: memref<1x16x64xf32, #tpu.memory_space<vmem>>, %arg4: memref<64x256xf32, #tpu.memory_space<vmem>>, %arg5: memref<64x256xf32, #tpu.memory_space<vmem>>, %arg6: memref<256x64xf32, #tpu.memory_space<vmem>>, %arg7: memref<256x64xf32, #tpu.memory_space<vmem>>, %arg8: memref<16x16xf32, #tpu.memory_space<vmem>>, %arg9: memref<16x64xf32, #tpu.memory_space<vmem>>, %arg10: memref<16x64xf32, #tpu.memory_space<vmem>>, %arg11: memref<1x16x256xf32, #tpu.memory_space<vmem>>, %arg12: memref<1x16x64xf32, #tpu.memory_space<vmem>>) attributes {dimension_semantics = [#tpu.dimension_semantics<parallel>, #tpu.dimension_semantics<parallel>], iteration_bounds = array<i64: 2, 1>, scalar_prefetch = 0 : i64, scratch_operands = 0 : i64, tpu.core_type = #tpu.core_type<tc>, window_params = [{transform_indices = @transform_0, window_bounds = array<i64: 1, 16, 64>}, {transform_indices = @transform_1, window_bounds = array<i64: 1, 16, 64>}, {pipeline_mode = #tpu.pipeline_mode<synchronous>, transform_indices = @transform_2, window_bounds = array<i64: 64, 256>}, {pipeline_mode = #tpu.pipeline_mode<synchronous>, transform_indices = @transform_3, window_bounds = array<i64: 64, 256>}, {pipeline_mode = #tpu.pipeline_mode<synchronous>, transform_indices = @transform_4, window_bounds = array<i64: 256, 64>}, {pipeline_mode = #tpu.pipeline_mode<synchronous>, transform_indices = @transform_5, window_bounds = array<i64: 256, 64>}, {pipeline_mode = #tpu.pipeline_mode<synchronous>, transform_indices = @transform_6, window_bounds = array<i64: 16, 16>}, {transform_indices = @transform_7, window_bounds = array<i64: 16, 64>}, {transform_indices = @transform_8, window_bounds = array<i64: 16, 64>}, {transform_indices = @transform_9, window_bounds = array<i64: 1, 16, 256>}, {transform_indices = @transform_10, window_bounds = array<i64: 1, 16, 64>}]} {
    %c0 = arith.constant 0 : index
    %c0_0 = arith.constant 0 : index
    %c0_1 = arith.constant 0 : index
    %0 = vector.load %arg2[%c0, %c0_0, %c0_1] : memref<1x16x64xf32, #tpu.memory_space<vmem>>, vector<1x16x64xf32>
    %1 = vector.shape_cast %0 : vector<1x16x64xf32> to vector<16x64xf32>
    %c0_2 = arith.constant 0 : index
    %c0_3 = arith.constant 0 : index
    %2 = vector.load %arg4[%c0_2, %c0_3] : memref<64x256xf32, #tpu.memory_space<vmem>>, vector<64x256xf32>
    %cst = arith.constant dense<0.000000e+00> : vector<16x256xf32>
    %3 = tpu.matmul %1, %2, %cst {dimension_numbers = #tpu.dot_dimension_numbers<[1], [0], [0], [1], [0, 0, 1, 1], [], []>} : vector<16x64xf32>, vector<64x256xf32>, vector<16x256xf32> -> vector<16x256xf32>
    %c0_4 = arith.constant 0 : index
    %c0_5 = arith.constant 0 : index
    %c0_6 = arith.constant 0 : index
    %4 = vector.load %arg3[%c0_4, %c0_5, %c0_6] : memref<1x16x64xf32, #tpu.memory_space<vmem>>, vector<1x16x64xf32>
    %5 = vector.shape_cast %4 : vector<1x16x64xf32> to vector<16x64xf32>
    %c0_7 = arith.constant 0 : index
    %c0_8 = arith.constant 0 : index
    %6 = vector.load %arg5[%c0_7, %c0_8] : memref<64x256xf32, #tpu.memory_space<vmem>>, vector<64x256xf32>
    %cst_9 = arith.constant dense<0.000000e+00> : vector<16x256xf32>
    %7 = tpu.matmul %5, %6, %cst_9 {dimension_numbers = #tpu.dot_dimension_numbers<[1], [0], [0], [1], [0, 0, 1, 1], [], []>} : vector<16x64xf32>, vector<64x256xf32>, vector<16x256xf32> -> vector<16x256xf32>
    %8 = arith.addf %3, %7 : vector<16x256xf32>
    %c0_10 = arith.constant 0 : index
    %c0_11 = arith.constant 0 : index
    %c0_12 = arith.constant 0 : index
    %9 = vector.load %arg11[%c0_10, %c0_11, %c0_12] : memref<1x16x256xf32, #tpu.memory_space<vmem>>, vector<1x16x256xf32>
    %10 = vector.shape_cast %9 : vector<1x16x256xf32> to vector<16x256xf32>
    %11 = vector.shape_cast %8 : vector<16x256xf32> to vector<1x16x256xf32>
    tpu.vector_store %arg11[%c0_10, %c0_11, %c0_12], %11 {strides = array<i32>} : memref<1x16x256xf32, #tpu.memory_space<vmem>>, vector<1x16x256xf32>,
    %c0_13 = arith.constant 0 : index
    %c0_14 = arith.constant 0 : index
    %12 = vector.load %arg6[%c0_13, %c0_14] : memref<256x64xf32, #tpu.memory_space<vmem>>, vector<256x64xf32>
    %cst_15 = arith.constant dense<0.000000e+00> : vector<16x64xf32>
    %13 = tpu.matmul %8, %12, %cst_15 {dimension_numbers = #tpu.dot_dimension_numbers<[1], [0], [0], [1], [0, 0, 1, 1], [], []>} : vector<16x256xf32>, vector<256x64xf32>, vector<16x64xf32> -> vector<16x64xf32>
    %c0_16 = arith.constant 0 : index
    %c0_17 = arith.constant 0 : index
    %14 = vector.load %arg9[%c0_16, %c0_17] : memref<16x64xf32, #tpu.memory_space<vmem>>, vector<16x64xf32>
    %15 = arith.mulf %13, %14 : vector<16x64xf32>
    %c0_18 = arith.constant 0 : index
    %c0_19 = arith.constant 0 : index
    %16 = vector.load %arg7[%c0_18, %c0_19] : memref<256x64xf32, #tpu.memory_space<vmem>>, vector<256x64xf32>
    %cst_20 = arith.constant dense<0.000000e+00> : vector<16x64xf32>
    %17 = tpu.matmul %8, %16, %cst_20 {dimension_numbers = #tpu.dot_dimension_numbers<[1], [0], [0], [1], [0, 0, 1, 1], [], []>} : vector<16x256xf32>, vector<256x64xf32>, vector<16x64xf32> -> vector<16x64xf32>
    %c0_21 = arith.constant 0 : index
    %c0_22 = arith.constant 0 : index
    %18 = vector.load %arg10[%c0_21, %c0_22] : memref<16x64xf32, #tpu.memory_space<vmem>>, vector<16x64xf32>
    %19 = arith.mulf %17, %18 : vector<16x64xf32>
    %c0_23 = arith.constant 0 : index
    %c0_24 = arith.constant 0 : index
    %20 = vector.load %arg8[%c0_23, %c0_24] : memref<16x16xf32, #tpu.memory_space<vmem>>, vector<16x16xf32>
    %cst_25 = arith.constant dense<0.000000e+00> : vector<16x64xf32>
    %21 = tpu.matmul %20, %19, %cst_25 {dimension_numbers = #tpu.dot_dimension_numbers<[1], [0], [0], [1], [0, 0, 1, 1], [], []>} : vector<16x16xf32>, vector<16x64xf32>, vector<16x64xf32> -> vector<16x64xf32>
    %22 = arith.addf %15, %21 : vector<16x64xf32>
    %c0_26 = arith.constant 0 : index
    %c0_27 = arith.constant 0 : index
    %c0_28 = arith.constant 0 : index
    %23 = vector.load %arg12[%c0_26, %c0_27, %c0_28] : memref<1x16x64xf32, #tpu.memory_space<vmem>>, vector<1x16x64xf32>
    %24 = vector.shape_cast %23 : vector<1x16x64xf32> to vector<16x64xf32>
    %25 = vector.shape_cast %22 : vector<16x64xf32> to vector<1x16x64xf32>
    tpu.vector_store %arg12[%c0_26, %c0_27, %c0_28], %25 {strides = array<i32>} : memref<1x16x64xf32, #tpu.memory_space<vmem>>, vector<1x16x64xf32>,
    return
  }
  func.func @transform_0(%arg0: i32, %arg1: i32) -> (i32, i32, i32) {
    %c0_i32 = arith.constant 0 : i32
    %c0_i32_0 = arith.constant 0 : i32
    return %arg0, %arg1, %c0_i32 : i32, i32, i32
  }
  func.func @transform_1(%arg0: i32, %arg1: i32) -> (i32, i32, i32) {
    %c0_i32 = arith.constant 0 : i32
    %c0_i32_0 = arith.constant 0 : i32
    return %arg0, %arg1, %c0_i32 : i32, i32, i32
  }
  func.func @transform_2(%arg0: i32, %arg1: i32) -> (i32, i32) {
    %c0_i32 = arith.constant 0 : i32
    %c0_i32_0 = arith.constant 0 : i32
    %c0_i32_1 = arith.constant 0 : i32
    return %c0_i32, %c0_i32_0 : i32, i32
  }
  func.func @transform_3(%arg0: i32, %arg1: i32) -> (i32, i32) {
    %c0_i32 = arith.constant 0 : i32
    %c0_i32_0 = arith.constant 0 : i32
    %c0_i32_1 = arith.constant 0 : i32
    return %c0_i32, %c0_i32_0 : i32, i32
  }
  func.func @transform_4(%arg0: i32, %arg1: i32) -> (i32, i32) {
    %c0_i32 = arith.constant 0 : i32
    %c0_i32_0 = arith.constant 0 : i32
    %c0_i32_1 = arith.constant 0 : i32
    return %c0_i32, %c0_i32_0 : i32, i32
  }
  func.func @transform_5(%arg0: i32, %arg1: i32) -> (i32, i32) {
    %c0_i32 = arith.constant 0 : i32
    %c0_i32_0 = arith.constant 0 : i32
    %c0_i32_1 = arith.constant 0 : i32
    return %c0_i32, %c0_i32_0 : i32, i32
  }
  func.func @transform_6(%arg0: i32, %arg1: i32) -> (i32, i32) {
    %c0_i32 = arith.constant 0 : i32
    %c0_i32_0 = arith.constant 0 : i32
    %c0_i32_1 = arith.constant 0 : i32
    return %c0_i32, %c0_i32_0 : i32, i32
  }
  func.func @transform_7(%arg0: i32, %arg1: i32) -> (i32, i32) {
    %c0_i32 = arith.constant 0 : i32
    %c0_i32_0 = arith.constant 0 : i32
    return %arg1, %c0_i32 : i32, i32
  }
  func.func @transform_8(%arg0: i32, %arg1: i32) -> (i32, i32) {
    %c0_i32 = arith.constant 0 : i32
    %c0_i32_0 = arith.constant 0 : i32
    return %arg1, %c0_i32 : i32, i32
  }
  func.func @transform_9(%arg0: i32, %arg1: i32) -> (i32, i32, i32) {
    %c0_i32 = arith.constant 0 : i32
    %c0_i32_0 = arith.constant 0 : i32
    return %arg0, %arg1, %c0_i32 : i32, i32, i32
  }
  func.func @transform_10(%arg0: i32, %arg1: i32) -> (i32, i32, i32) {
    %c0_i32 = arith.constant 0 : i32
    %c0_i32_0 = arith.constant 0 : i32
    return %arg0, %arg1, %c0_i32 : i32, i32, i32
  }
}

module attributes {stable_mosaic.version = 11 : i64} {
  func.func @kernel(%arg0: i32, %arg1: i32, %arg2: memref<1x16x64xf32, #tpu.memory_space<vmem>>, %arg3: memref<1x16x64xf32, #tpu.memory_space<vmem>>, %arg4: memref<64x256xf32, #tpu.memory_space<vmem>>, %arg5: memref<64x256xf32, #tpu.memory_space<vmem>>, %arg6: memref<256x64xf32, #tpu.memory_space<vmem>>, %arg7: memref<256x64xf32, #tpu.memory_space<vmem>>, %arg8: memref<16x16xf32, #tpu.memory_space<vmem>>, %arg9: memref<16x64xf32, #tpu.memory_space<vmem>>, %arg10: memref<16x64xf32, #tpu.memory_space<vmem>>, %arg11: memref<1x16x256xf32, #tpu.memory_space<vmem>>, %arg12: memref<1x16x64xf32, #tpu.memory_space<vmem>>) attributes {dimension_semantics = [#tpu.dimension_semantics<parallel>, #tpu.dimension_semantics<parallel>], iteration_bounds = array<i64: 2, 1>, scalar_prefetch = 0 : i64, scratch_operands = 0 : i64, tpu.core_type = #tpu.core_type<tc>, window_params = [{transform_indices = @transform_0, window_bounds = array<i64: 1, 16, 64>}, {transform_indices = @transform_1, window_bounds = array<i64: 1, 16, 64>}, {pipeline_mode = #tpu.pipeline_mode<synchronous>, transform_indices = @transform_2, window_bounds = array<i64: 64, 256>}, {pipeline_mode = #tpu.pipeline_mode<synchronous>, transform_indices = @transform_3, window_bounds = array<i64: 64, 256>}, {pipeline_mode = #tpu.pipeline_mode<synchronous>, transform_indices = @transform_4, window_bounds = array<i64: 256, 64>}, {pipeline_mode = #tpu.pipeline_mode<synchronous>, transform_indices = @transform_5, window_bounds = array<i64: 256, 64>}, {pipeline_mode = #tpu.pipeline_mode<synchronous>, transform_indices = @transform_6, window_bounds = array<i64: 16, 16>}, {transform_indices = @transform_7, window_bounds = array<i64: 16, 64>}, {transform_indices = @transform_8, window_bounds = array<i64: 16, 64>}, {transform_indices = @transform_9, window_bounds = array<i64: 1, 16, 256>}, {transform_indices = @transform_10, window_bounds = array<i64: 1, 16, 64>}]} {
    %c0 = arith.constant 0 : index
    %c0_0 = arith.constant 0 : index
    %c0_1 = arith.constant 0 : index
    %0 = vector.load %arg2[%c0, %c0_0, %c0_1] : memref<1x16x64xf32, #tpu.memory_space<vmem>>, vector<1x16x64xf32>
    %1 = vector.shape_cast %0 : vector<1x16x64xf32> to vector<16x64xf32>
    %c0_2 = arith.constant 0 : index
    %c0_3 = arith.constant 0 : index
    %2 = vector.load %arg4[%c0_2, %c0_3] : memref<64x256xf32, #tpu.memory_space<vmem>>, vector<64x256xf32>
    %cst = arith.constant dense<0.000000e+00> : vector<16x256xf32>
    %3 = tpu.matmul %1, %2, %cst {dimension_numbers = #tpu.dot_dimension_numbers<[1], [0], [0], [1], [0, 0, 1, 1], [], []>} : vector<16x64xf32>, vector<64x256xf32>, vector<16x256xf32> -> vector<16x256xf32>
    %c0_4 = arith.constant 0 : index
    %c0_5 = arith.constant 0 : index
    %c0_6 = arith.constant 0 : index
    %4 = vector.load %arg3[%c0_4, %c0_5, %c0_6] : memref<1x16x64xf32, #tpu.memory_space<vmem>>, vector<1x16x64xf32>
    %5 = vector.shape_cast %4 : vector<1x16x64xf32> to vector<16x64xf32>
    %c0_7 = arith.constant 0 : index
    %c0_8 = arith.constant 0 : index
    %6 = vector.load %arg5[%c0_7, %c0_8] : memref<64x256xf32, #tpu.memory_space<vmem>>, vector<64x256xf32>
    %cst_9 = arith.constant dense<0.000000e+00> : vector<16x256xf32>
    %7 = tpu.matmul %5, %6, %cst_9 {dimension_numbers = #tpu.dot_dimension_numbers<[1], [0], [0], [1], [0, 0, 1, 1], [], []>} : vector<16x64xf32>, vector<64x256xf32>, vector<16x256xf32> -> vector<16x256xf32>
    %8 = arith.addf %3, %7 : vector<16x256xf32>
    %c0_10 = arith.constant 0 : index
    %c0_11 = arith.constant 0 : index
    %c0_12 = arith.constant 0 : index
    %9 = vector.load %arg11[%c0_10, %c0_11, %c0_12] : memref<1x16x256xf32, #tpu.memory_space<vmem>>, vector<1x16x256xf32>
    %10 = vector.shape_cast %9 : vector<1x16x256xf32> to vector<16x256xf32>
    %11 = vector.shape_cast %8 : vector<16x256xf32> to vector<1x16x256xf32>
    tpu.vector_store %arg11[%c0_10, %c0_11, %c0_12], %11 {strides = array<i32>} : memref<1x16x256xf32, #tpu.memory_space<vmem>>, vector<1x16x256xf32>,
    %c0_13 = arith.constant 0 : index
    %c0_14 = arith.constant 0 : index
    %12 = vector.load %arg6[%c0_13, %c0_14] : memref<256x64xf32, #tpu.memory_space<vmem>>, vector<256x64xf32>
    %cst_15 = arith.constant dense<0.000000e+00> : vector<16x64xf32>
    %13 = tpu.matmul %8, %12, %cst_15 {dimension_numbers = #tpu.dot_dimension_numbers<[1], [0], [0], [1], [0, 0, 1, 1], [], []>} : vector<16x256xf32>, vector<256x64xf32>, vector<16x64xf32> -> vector<16x64xf32>
    %c0_16 = arith.constant 0 : index
    %c0_17 = arith.constant 0 : index
    %14 = vector.load %arg9[%c0_16, %c0_17] : memref<16x64xf32, #tpu.memory_space<vmem>>, vector<16x64xf32>
    %15 = arith.mulf %13, %14 : vector<16x64xf32>
    %c0_18 = arith.constant 0 : index
    %c0_19 = arith.constant 0 : index
    %16 = vector.load %arg7[%c0_18, %c0_19] : memref<256x64xf32, #tpu.memory_space<vmem>>, vector<256x64xf32>
    %cst_20 = arith.constant dense<0.000000e+00> : vector<16x64xf32>
    %17 = tpu.matmul %8, %16, %cst_20 {dimension_numbers = #tpu.dot_dimension_numbers<[1], [0], [0], [1], [0, 0, 1, 1], [], []>} : vector<16x256xf32>, vector<256x64xf32>, vector<16x64xf32> -> vector<16x64xf32>
    %c0_21 = arith.constant 0 : index
    %c0_22 = arith.constant 0 : index
    %18 = vector.load %arg10[%c0_21, %c0_22] : memref<16x64xf32, #tpu.memory_space<vmem>>, vector<16x64xf32>
    %19 = arith.mulf %17, %18 : vector<16x64xf32>
    %c0_23 = arith.constant 0 : index
    %c0_24 = arith.constant 0 : index
    %20 = vector.load %arg8[%c0_23, %c0_24] : memref<16x16xf32, #tpu.memory_space<vmem>>, vector<16x16xf32>
    %cst_25 = arith.constant dense<0.000000e+00> : vector<16x64xf32>
    %21 = tpu.matmul %20, %19, %cst_25 {dimension_numbers = #tpu.dot_dimension_numbers<[1], [0], [0], [1], [0, 0, 1, 1], [], []>} : vector<16x16xf32>, vector<16x64xf32>, vector<16x64xf32> -> vector<16x64xf32>
    %22 = arith.addf %15, %21 : vector<16x64xf32>
    %c0_26 = arith.constant 0 : index
    %c0_27 = arith.constant 0 : index
    %c0_28 = arith.constant 0 : index
    %23 = vector.load %arg12[%c0_26, %c0_27, %c0_28] : memref<1x16x64xf32, #tpu.memory_space<vmem>>, vector<1x16x64xf32>
    %24 = vector.shape_cast %23 : vector<1x16x64xf32> to vector<16x64xf32>
    %25 = vector.shape_cast %22 : vector<16x64xf32> to vector<1x16x64xf32>
    tpu.vector_store %arg12[%c0_26, %c0_27, %c0_28], %25 {strides = array<i32>} : memref<1x16x64xf32, #tpu.memory_space<vmem>>, vector<1x16x64xf32>,
    return
  }
  func.func @transform_0(%arg0: i32, %arg1: i32) -> (i32, i32, i32) {
    %c0_i32 = arith.constant 0 : i32
    %c0_i32_0 = arith.constant 0 : i32
    return %arg0, %arg1, %c0_i32 : i32, i32, i32
  }
  func.func @transform_1(%arg0: i32, %arg1: i32) -> (i32, i32, i32) {
    %c0_i32 = arith.constant 0 : i32
    %c0_i32_0 = arith.constant 0 : i32
    return %arg0, %arg1, %c0_i32 : i32, i32, i32
  }
  func.func @transform_2(%arg0: i32, %arg1: i32) -> (i32, i32) {
    %c0_i32 = arith.constant 0 : i32
    %c0_i32_0 = arith.constant 0 : i32
    %c0_i32_1 = arith.constant 0 : i32
    return %c0_i32, %c0_i32_0 : i32, i32
  }
  func.func @transform_3(%arg0: i32, %arg1: i32) -> (i32, i32) {
    %c0_i32 = arith.constant 0 : i32
    %c0_i32_0 = arith.constant 0 : i32
    %c0_i32_1 = arith.constant 0 : i32
    return %c0_i32, %c0_i32_0 : i32, i32
  }
  func.func @transform_4(%arg0: i32, %arg1: i32) -> (i32, i32) {
    %c0_i32 = arith.constant 0 : i32
    %c0_i32_0 = arith.constant 0 : i32
    %c0_i32_1 = arith.constant 0 : i32
    return %c0_i32, %c0_i32_0 : i32, i32
  }
  func.func @transform_5(%arg0: i32, %arg1: i32) -> (i32, i32) {
    %c0_i32 = arith.constant 0 : i32
    %c0_i32_0 = arith.constant 0 : i32
    %c0_i32_1 = arith.constant 0 : i32
    return %c0_i32, %c0_i32_0 : i32, i32
  }
  func.func @transform_6(%arg0: i32, %arg1: i32) -> (i32, i32) {
    %c0_i32 = arith.constant 0 : i32
    %c0_i32_0 = arith.constant 0 : i32
    %c0_i32_1 = arith.constant 0 : i32
    return %c0_i32, %c0_i32_0 : i32, i32
  }
  func.func @transform_7(%arg0: i32, %arg1: i32) -> (i32, i32) {
    %c0_i32 = arith.constant 0 : i32
    %c0_i32_0 = arith.constant 0 : i32
    return %arg1, %c0_i32 : i32, i32
  }
  func.func @transform_8(%arg0: i32, %arg1: i32) -> (i32, i32) {
    %c0_i32 = arith.constant 0 : i32
    %c0_i32_0 = arith.constant 0 : i32
    return %arg1, %c0_i32 : i32, i32
  }
  func.func @transform_9(%arg0: i32, %arg1: i32) -> (i32, i32, i32) {
    %c0_i32 = arith.constant 0 : i32
    %c0_i32_0 = arith.constant 0 : i32
    return %arg0, %arg1, %c0_i32 : i32, i32, i32
  }
  func.func @transform_10(%arg0: i32, %arg1: i32) -> (i32, i32, i32) {
    %c0_i32 = arith.constant 0 : i32
    %c0_i32_0 = arith.constant 0 : i32
    return %arg0, %arg1, %c0_i32 : i32, i32, i32
  }
}

</mosaic_0001>

<bundles_post_ra>
// kernel: tpu_custom_call.1
= control target key start
LH: loop header
LB: loop body
LE: loop exit
PB: predicated region body
PF: predicated region fallthrough
CT: control target
= control target key end

     0   :  { %16 = vsyncpa [#allocation3], 0  ;;  %s2033_s0 = inlined_call_operand.vmem [shape: f32[2,16,64], index: 0, kind: input, shape index: {}]   ;;  %s2034_s1 = inlined_call_operand.vmem [shape: f32[2,16,64], index: 1, kind: input, shape index: {}]   ;;  %s2035_s2 = inlined_call_operand.vmem [shape: f32[64,256], index: 2, kind: input, shape index: {}]   ;;  %s2036_s3 = inlined_call_operand.vmem [shape: f32[64,256], index: 3, kind: input, shape index: {}]   ;;  %s2037_s4 = inlined_call_operand.vmem [shape: f32[256,64], index: 4, kind: input, shape index: {}]   ;;  %s2038_s5 = inlined_call_operand.vmem [shape: f32[256,64], index: 5, kind: input, shape index: {}]   ;;  %s2039_s6 = inlined_call_operand.vmem [shape: f32[16,16], index: 6, kind: input, shape index: {}]   ;;  %s2040_s7 = inlined_call_operand.vmem [shape: f32[16,64], index: 7, kind: input, shape index: {}]   ;;  %s2041_s8 = inlined_call_operand.vmem [shape: f32[16,64], index: 8, kind: input, shape index: {}]   ;;  %s2042_s9 = inlined_call_operand.hbm [shape: f32[2,16,256], index: 9, kind: output, shape index: {0}]   ;;  %s2043_s10 = inlined_call_operand.hbm [shape: f32[2,16,64], index: 10, kind: output, shape index: {1}]  }
   0x1   :  { %18 = vsyncpa [#allocation3 + $0x1], 0 }
   0x2   :  { %19 = vsyncpa [#allocation5], 0 }
   0x3   :  { %21 = vsyncpa [#allocation5 + $0x1], 0  ;;  %s1555_s13 = smov 0   ;;  %s1557_s14 = smov 0  }
   0x4   :  { %s1559_s15 = smov 0   ;;  %s1561_s16 = smov 0  }
   0x5   :  { %s1563_s17 = smov 0   ;;  %s1565_s18 = smov 0  }
   0x6 LB: > { %2046 = sst [smem:[#allocation8_spill]] %s1487_s17  ;;  %s1202_s19 = sadd.s32 4294967295, %s1491_s18   ;;  %s1491_s18 = sphi %s1565_s18, %s27_s18   ;;  %s1487_s17 = sphi %s1563_s17, %s2053_s17   ;;  %s1483_s16 = sphi %s1561_s16, %s2052_s16   ;;  %s1479_s15 = sphi %s1559_s15, %s2056_s15   ;;  %s1475_s14 = sphi %s1557_s14, %s2055_s14   ;;  %s1471_s13 = sphi %s1555_s13, %s2054_s13  }
   0x7   : > { %s1203_s20 = sadd.s32 4294967294, %s1491_s18   ;;  %s39_s21 = sadd.s32 1, %s1487_s17 }
   0x8   : > { %s261_s22 = sadd.s32 1, %s1479_s15  ;;  %p41_p0 = scmp.ge.s32.totalorder %s39_s21, 2 }
   0x9   : > { %p271_p1 = scmp.ne.s32.totalorder %s1479_s15, %s1475_s14  ;;  %p272_p2 = scmp.eq.s32.totalorder %s1202_s19, 1 }
   0xa   : > { %p277_p3 = scmp.ne.s32.totalorder %s1475_s14, %s1471_s13  ;;  %s2058_s21 = smov (%p41_p0, %s39_s21), 0 }
   0xb   : > { %2047 = sst [smem:[#allocation9_spill]] %s2058_s21  ;;  %p1595_p4 = por %p272_p2, %p271_p1 }
   0xc   : > { %p278_p5 = scmp.eq.s32.totalorder %s1203_s20, 1  ;;  %s256_s24 = ssub.s32 %s1487_s17, %s2058_s21 }
   0xd   : > { %p1208_p6 = scmp.ge.s32.totalorder %s1491_s18, 1  ;;  %p259_p7 = scmp.eq.s32.totalorder %s256_s24, 0 }
   0xe   : > { %p1602_p8 = por %p278_p5, %p277_p3  ;;  %p383_p9 = scmp.lt.s32.totalorder %s1491_s18, 3 }
   0xf   : > { %s1608_s26 = scalar_select %p259_p7, %s1479_s15, %s261_s22  }
  0x10   : > { %p384_p10 = pnand %p1208_p6, %p383_p9 }
  0x11   : > { %2050 = sst [smem:[#allocation10_spill]] %s1608_s26  ;;  %p450_p11 = scmp.lt.s32.totalorder (!%p384_p10), %s1483_s16, 1 }
  0x12   : > { %387 = sbr.rel (%p384_p10) target bundleno = 657 (0x291), region = 56  ;;  %s1231_s22 = sshll.u32 (!%p384_p10), %s1483_s16, 9 }
  0x13   : > { %s1946_s30 = scalar_lea.hbm (!%p384_p10), %s2042_s9, %s1231_s22  ;;  %s1494_s11 = smov (!%p384_p10), [#allocation2]  }
  0x14   : > { %s1389_s12 = sshll.u32 (!%p384_p10), %s1494_s11, 4  ;;  %s1390_s12 = int_to_ptr.vmem [resolvable:$false] %s1389_s12 }
  0x17   : > { %v518_v0 = vld [vmem:[%s2036_s3 + $0x78] sm:$0xff]  ;;  %v517_v2 = vld [vmem:[%s2036_s3 + $0x70] sm:$0xff]  ;;  %v516_v4 = vld [vmem:[%s2036_s3 + $0x68] sm:$0xff]  ;;  %s1662_s29 = scalar_select %p450_p11, %s1483_s16, 1  ;;  %vm519_vm0 = vcmask 523264   ;;  %v1493_v34 = vmov 0.0  }
  0x18   : > { %v500_v1 = vld [vmem:[%s2035_s2 + $0x78] sm:$0xff]  ;;  %542 = vmatprep.subr.mxu0 %v518_v0  ;;  %v499_v3 = vld [vmem:[%s2035_s2 + $0x70] sm:$0xff]  ;;  %v498_v5 = vld [vmem:[%s2035_s2 + $0x68] sm:$0xff]  ;;  %590 = vmatprep.mubr.f32.mxu0 %v1493_v34  ;;  %vm914_vm1 = vcmask 130048  }
  0x19   : > { %625 = vmatprep.subr.mxu1 %v500_v1  ;;  %543 = vmatpush1.msra.mxu0 %v517_v2  ;;  %v515_v6 = vld [vmem:[%s2036_s3 + $0x60] sm:$0xff]  ;;  %v514_v8 = vld [vmem:[%s2036_s3 + $0x58] sm:$0xff]  ;;  %v513_v10 = vld [vmem:[%s2036_s3 + $0x50] sm:$0xff]  ;;  %s1229_s24 = sshll.u32 %s1662_s29, 4 }
  0x1a   : > { %626 = vmatpush1.msra.mxu1 %v499_v3  ;;  %v497_v7 = vld [vmem:[%s2035_s2 + $0x60] sm:$0xff]  ;;  %544 = vmatprep.subr.mxu0 %v516_v4  ;;  %v496_v9 = vld [vmem:[%s2035_s2 + $0x58] sm:$0xff]  ;;  %v495_v11 = vld [vmem:[%s2035_s2 + $0x50] sm:$0xff]  ;;  %s467_s17 = scalar_lea.vmem %s2034_s1, %s1229_s24  ;;  %s457_s26 = scalar_lea.vmem %s2033_s0, %s1229_s24 }
  0x1b   : > { %627 = vmatprep.subr.mxu1 %v498_v5  ;;  %545 = vmatpush1.msra.mxu0 %v515_v6  ;;  %v512_v12 = vld [vmem:[%s2036_s3 + $0x48] sm:$0xff]  ;;  %v511_v14 = vld [vmem:[%s2036_s3 + $0x40] sm:$0xff]  ;;  %v510_v16 = vld [vmem:[%s2036_s3 + $0x38] sm:$0xff]  ;;  %s1916_s24 = sand.u32 1, %s1475_s14  }
  0x1c   : > { %628 = vmatpush1.msra.mxu1 %v497_v7  ;;  %v494_v13 = vld [vmem:[%s2035_s2 + $0x48] sm:$0xff]  ;;  %546 = vmatprep.subr.mxu0 %v514_v8  ;;  %v493_v15 = vld [vmem:[%s2035_s2 + $0x40] sm:$0xff]  ;;  %v492_v17 = vld [vmem:[%s2035_s2 + $0x38] sm:$0xff]  ;;  %s1209_s27 = sshll.u32 %s1916_s24, 5 }
  0x1d   : > { %629 = vmatprep.subr.mxu1 %v496_v9  ;;  %547 = vmatpush1.msra.mxu0 %v513_v10  ;;  %v509_v18 = vld [vmem:[%s2036_s3 + $0x30] sm:$0xff]  ;;  %v508_v20 = vld [vmem:[%s2036_s3 + $0x28] sm:$0xff]  ;;  %v507_v22 = vld [vmem:[%s2036_s3 + $0x20] sm:$0xff]  ;;  %s1919_s21 = scalar_lea.vmem [#allocation2], %s1209_s27 }
  0x1e   : > { %630 = vmatpush1.msra.mxu1 %v495_v11  ;;  %548 = vmatprep.subr.mxu0 %v512_v12  ;;  %v491_v19 = vld [vmem:[%s2035_s2 + $0x30] sm:$0xff]  ;;  %v490_v21 = vld [vmem:[%s2035_s2 + $0x28] sm:$0xff]  ;;  %v489_v23 = vld [vmem:[%s2035_s2 + $0x20] sm:$0xff]  ;;  %s1022_s29 = sshll.u32 %s1919_s21, 4  ;;  %s1940_s29 = int_to_ptr.vmem [resolvable:$true] %s1022_s29 }
  0x1f   : > { %631 = vmatprep.subr.mxu1 %v494_v13  ;;  %549 = vmatpush1.msra.mxu0 %v511_v14  ;;  %v506_v24 = vld [vmem:[%s2036_s3 + $0x18] sm:$0xff]  ;;  %v505_v26 = vld [vmem:[%s2036_s3 + $0x10] sm:$0xff]  ;;  %v504_v28 = vld [vmem:[%s2036_s3 + $0x8] sm:$0xff]  ;;  %p1392_p1 = scmp.lt.s32.totalorder %s1940_s29, %s1390_s12 }
  0x20   : > { %632 = vmatpush1.msra.mxu1 %v493_v15  ;;  %550 = vmatprep.subr.mxu0 %v510_v16  ;;  %v488_v25 = vld [vmem:[%s2035_s2 + $0x18] sm:$0xff]  ;;  %v487_v27 = vld [vmem:[%s2035_s2 + $0x10] sm:$0xff]  ;;  %v486_v29 = vld [vmem:[%s2035_s2 + $0x8] sm:$0xff] }
  0x21   : > { %633 = vmatprep.subr.mxu1 %v492_v17  ;;  %551 = vmatpush1.msra.mxu0 %v509_v18  ;;  %v503_v30 = vld [vmem:[%s2036_s3] sm:$0xff]  ;;  %v721_v35 = vld [vmem:[%s2037_s4 + $0xf8] sm:$0xff]  ;;  %v502_v39 = vld [vmem:[%s467_s17 + $0x8] sm:$0xff] }
  0x22   : > { %634 = vmatpush1.msra.mxu1 %v491_v19  ;;  %552 = vmatprep.subr.mxu0 %v508_v20  ;;  %v485_v31 = vld [vmem:[%s2035_s2] sm:$0xff]  ;;  %v832_v36 = vld [vmem:[%s2038_s5 + $0xf8] sm:$0xff]  ;;  %v484_v40 = vld [vmem:[%s457_s26 + $0x8] sm:$0xff] }
  0x23   : > { %635 = vmatprep.subr.mxu1 %v490_v21  ;;  %553 = vmatpush1.msra.mxu0 %v507_v22  ;;  %v501_v32 = vld [vmem:[%s467_s17] sm:$0xff]  ;;  %v705_v37 = vld [vmem:[%s2037_s4 + $0x78] sm:$0xff]  ;;  %v720_v41 = vld [vmem:[%s2037_s4 + $0xf0] sm:$0xff]  ;;  %s1001_s17 = scalar_lea.sflag [#allocation3], %s1916_s24 }
  0x24   : > { %636 = vmatpush1.msra.mxu1 %v489_v23  ;;  %554 = vmatprep.subr.mxu0 %v506_v24  ;;  %v483_v33 = vld [vmem:[%s457_s26] sm:$0xff]  ;;  %v816_v38 = vld [vmem:[%s2038_s5 + $0x78] sm:$0xff]  ;;  %v831_v42 = vld [vmem:[%s2038_s5 + $0xf0] sm:$0xff]  ;;  %s1385_s26 = scalar_lea.vmem %s1940_s29, 512 }
  0x25   : > { %637 = vmatprep.subr.mxu1 %v488_v25  ;;  %555 = vmatpush1.msra.mxu0 %v505_v26  ;;  %v704_v43 = vld [vmem:[%s2037_s4 + $0x70] sm:$0xff]  ;;  %v719_v45 = vld [vmem:[%s2037_s4 + $0xe8] sm:$0xff]  ;;  %v718_v49 = vld [vmem:[%s2037_s4 + $0xe0] sm:$0xff]  ;;  %p1386_p12 = scmp.ne.s32.totalorder %s1940_s29, %s1385_s26 }
  0x26   : > { %638 = vmatpush1.msra.mxu1 %v487_v27  ;;  %556 = vmatprep.subr.mxu0 %v504_v28  ;;  %v815_v44 = vld [vmem:[%s2038_s5 + $0x70] sm:$0xff]  ;;  %v830_v46 = vld [vmem:[%s2038_s5 + $0xe8] sm:$0xff]  ;;  %v829_v50 = vld [vmem:[%s2038_s5 + $0xe0] sm:$0xff] }
  0x27   : > { %639 = vmatprep.subr.mxu1 %v486_v29  ;;  %557 = vmatpush1.msra.mxu0 %v503_v30  ;;  %v703_v47 = vld [vmem:[%s2037_s4 + $0x68] sm:$0xff]  ;;  %v702_v51 = vld [vmem:[%s2037_s4 + $0x60] sm:$0xff]  ;;  %v717_v53 = vld [vmem:[%s2037_s4 + $0xd8] sm:$0xff]  ;;  %p1387_p13 = pnand %p1386_p12, %p1595_p4 }
  0x28   : > { %640 = vmatpush1.msra.mxu1 %v485_v31  ;;  %673 = vmatprep.mubr.f32.mxu1 %v1493_v34  ;;  %v814_v48 = vld [vmem:[%s2038_s5 + $0x68] sm:$0xff]  ;;  %v813_v52 = vld [vmem:[%s2038_s5 + $0x60] sm:$0xff]  ;;  %v828_v54 = vld [vmem:[%s2038_s5 + $0xd8] sm:$0xff] }
  0x29   : > { %1215 = vmatmul.mubr.msk.f32.vlgmr.msra.gmra.mxu0 %vm519_vm0, %v501_v32  ;;  %1217 = vmatmul.mubr.msk.f32.vlgmr.msra.gmra.mxu1 %vm519_vm0, %v483_v33  ;;  %v701_v55 = vld [vmem:[%s2037_s4 + $0x58] sm:$0xff]  ;;  %v716_v57 = vld [vmem:[%s2037_s4 + $0xd0] sm:$0xff]  ;;  %v715_v61 = vld [vmem:[%s2037_s4 + $0xc8] sm:$0xff]  ;;  %p1388_p0 = pneg %p1387_p13 }
  0x2a   : > { %596 = vmatprep.mubr.f32.mxu0 %v1493_v34  ;;  %679 = vmatprep.mubr.f32.mxu1 %v1493_v34  ;;  %v812_v56 = vld [vmem:[%s2038_s5 + $0x58] sm:$0xff]  ;;  %v827_v58 = vld [vmem:[%s2038_s5 + $0xd0] sm:$0xff]  ;;  %v826_v62 = vld [vmem:[%s2038_s5 + $0xc8] sm:$0xff] }
  0x2b   : > { %1233 = vmatprep.subr.mxu0 %v721_v35  ;;  %1271 = vmatprep.subr.mxu1 %v832_v36  ;;  %v700_v59 = vld [vmem:[%s2037_s4 + $0x50] sm:$0xff]  ;;  %v699_v63 = vld [vmem:[%s2037_s4 + $0x48] sm:$0xff]  ;;  %v714_v1 = vld [vmem:[%s2037_s4 + $0xc0] sm:$0xff] }
  0x2c   : > { %1234 = vmatpush3.msra.mxu0 %v705_v37  ;;  %1272 = vmatpush3.msra.mxu1 %v816_v38  ;;  %v811_v60 = vld [vmem:[%s2038_s5 + $0x50] sm:$0xff]  ;;  %v810_v0 = vld [vmem:[%s2038_s5 + $0x48] sm:$0xff]  ;;  %v825_v2 = vld [vmem:[%s2038_s5 + $0xc0] sm:$0xff] }
  0x2d   : > { %1216 = vmatmul.mubr.msk.f32.gmra.mxu0 %vm519_vm0, %v502_v39  ;;  %1218 = vmatmul.mubr.msk.f32.gmra.mxu1 %vm519_vm0, %v484_v40  ;;  %v698_v3 = vld [vmem:[%s2037_s4 + $0x40] sm:$0xff]  ;;  %v713_v5 = vld [vmem:[%s2037_s4 + $0xb8] sm:$0xff]  ;;  %v712_v9 = vld [vmem:[%s2037_s4 + $0xb0] sm:$0xff] }
  0x2e   : > { %1235 = vmatprep.subr.mxu0 %v720_v41  ;;  %1273 = vmatprep.subr.mxu1 %v831_v42  ;;  %v809_v4 = vld [vmem:[%s2038_s5 + $0x40] sm:$0xff]  ;;  %v824_v6 = vld [vmem:[%s2038_s5 + $0xb8] sm:$0xff]  ;;  %v823_v10 = vld [vmem:[%s2038_s5 + $0xb0] sm:$0xff] }
  0x2f   : > { %1236 = vmatpush3.msra.mxu0 %v704_v43  ;;  %1274 = vmatpush3.msra.mxu1 %v815_v44  ;;  %v697_v7 = vld [vmem:[%s2037_s4 + $0x38] sm:$0xff]  ;;  %v696_v11 = vld [vmem:[%s2037_s4 + $0x30] sm:$0xff]  ;;  %v711_v13 = vld [vmem:[%s2037_s4 + $0xa8] sm:$0xff] }
  0x30   : > { %1237 = vmatprep.subr.mxu0 %v719_v45  ;;  %1275 = vmatprep.subr.mxu1 %v830_v46  ;;  %v808_v8 = vld [vmem:[%s2038_s5 + $0x38] sm:$0xff]  ;;  %v807_v12 = vld [vmem:[%s2038_s5 + $0x30] sm:$0xff]  ;;  %v822_v14 = vld [vmem:[%s2038_s5 + $0xa8] sm:$0xff] }
  0x31   : > { %1238 = vmatpush3.msra.mxu0 %v703_v47  ;;  %1276 = vmatpush3.msra.mxu1 %v814_v48  ;;  %v695_v15 = vld [vmem:[%s2037_s4 + $0x28] sm:$0xff]  ;;  %v710_v17 = vld [vmem:[%s2037_s4 + $0xa0] sm:$0xff]  ;;  %v709_v21 = vld [vmem:[%s2037_s4 + $0x98] sm:$0xff] }
  0x32   : > { %1239 = vmatprep.subr.mxu0 %v718_v49  ;;  %1277 = vmatprep.subr.mxu1 %v829_v50  ;;  %v806_v16 = vld [vmem:[%s2038_s5 + $0x28] sm:$0xff]  ;;  %v821_v18 = vld [vmem:[%s2038_s5 + $0xa0] sm:$0xff]  ;;  %v820_v22 = vld [vmem:[%s2038_s5 + $0x98] sm:$0xff] }
  0x33   : > { %1240 = vmatpush3.msra.mxu0 %v702_v51  ;;  %1278 = vmatpush3.msra.mxu1 %v813_v52  ;;  %v694_v19 = vld [vmem:[%s2037_s4 + $0x20] sm:$0xff]  ;;  %v693_v23 = vld [vmem:[%s2037_s4 + $0x18] sm:$0xff]  ;;  %v708_v25 = vld [vmem:[%s2037_s4 + $0x90] sm:$0xff] }
  0x34   : > { %1241 = vmatprep.subr.mxu0 %v717_v53  ;;  %1279 = vmatprep.subr.mxu1 %v828_v54  ;;  %v805_v20 = vld [vmem:[%s2038_s5 + $0x20] sm:$0xff]  ;;  %v804_v24 = vld [vmem:[%s2038_s5 + $0x18] sm:$0xff]  ;;  %v819_v26 = vld [vmem:[%s2038_s5 + $0x90] sm:$0xff] }
  0x35   : > { %1242 = vmatpush3.msra.mxu0 %v701_v55  ;;  %1280 = vmatpush3.msra.mxu1 %v812_v56  ;;  %v692_v27 = vld [vmem:[%s2037_s4 + $0x10] sm:$0xff]  ;;  %v707_v29 = vld [vmem:[%s2037_s4 + $0x88] sm:$0xff]  ;;  %v706_v33 = vld [vmem:[%s2037_s4 + $0x80] sm:$0xff] }
  0x36   : > { %1243 = vmatprep.subr.mxu0 %v716_v57  ;;  %1281 = vmatprep.subr.mxu1 %v827_v58  ;;  %v803_v28 = vld [vmem:[%s2038_s5 + $0x10] sm:$0xff]  ;;  %v818_v30 = vld [vmem:[%s2038_s5 + $0x88] sm:$0xff]  ;;  %v817_v34 = vld [vmem:[%s2038_s5 + $0x80] sm:$0xff] }
  0x37   : > { %1244 = vmatpush3.msra.mxu0 %v700_v59  ;;  %1282 = vmatpush3.msra.mxu1 %v811_v60  ;;  %v691_v31 = vld [vmem:[%s2037_s4 + $0x8] sm:$0xff]  ;;  %v690_v35 = vld [vmem:[%s2037_s4] sm:$0xff] }
  0x38   : > { %1245 = vmatprep.subr.mxu0 %v715_v61  ;;  %1283 = vmatprep.subr.mxu1 %v826_v62  ;;  %v802_v32 = vld [vmem:[%s2038_s5 + $0x8] sm:$0xff]  ;;  %v801_v36 = vld [vmem:[%s2038_s5] sm:$0xff] }
  0x39   : > { %1246 = vmatpush3.msra.mxu0 %v699_v63  ;;  %1284 = vmatpush3.msra.mxu1 %v810_v0  ;;  %v912_v49 = vld [vmem:[%s2039_s6] sm:$0xff]  ;;  %v909_v54 = vld [vmem:[%s2041_s8 + $0x8] sm:$0xff] }
  0x3a   : > { %1247 = vmatprep.subr.mxu0 %v714_v1  ;;  %1285 = vmatprep.subr.mxu1 %v825_v2  ;;  %v908_v57 = vld [vmem:[%s2041_s8] sm:$0xff]  ;;  %v913_v60 = vld [vmem:[%s2039_s6 + $0x8] sm:$0xff] }
  0x3b   : > { %1248 = vmatpush3.msra.mxu0 %v698_v3  ;;  %1286 = vmatpush3.msra.mxu1 %v809_v4 }
  0x3c   : > { %1249 = vmatprep.subr.mxu0 %v713_v5  ;;  %1287 = vmatprep.subr.mxu1 %v824_v6 }
  0x3d   : > { %1250 = vmatpush3.msra.mxu0 %v697_v7  ;;  %1288 = vmatpush3.msra.mxu1 %v808_v8 }
  0x3e   : > { %1251 = vmatprep.subr.mxu0 %v712_v9  ;;  %1289 = vmatprep.subr.mxu1 %v823_v10 }
  0x3f   : > { %1252 = vmatpush3.msra.mxu0 %v696_v11  ;;  %1290 = vmatpush3.msra.mxu1 %v807_v12 }
  0x40   : > { %1253 = vmatprep.subr.mxu0 %v711_v13  ;;  %1291 = vmatprep.subr.mxu1 %v822_v14 }
  0x41   : > { %1254 = vmatpush3.msra.mxu0 %v695_v15  ;;  %1292 = vmatpush3.msra.mxu1 %v806_v16 }
  0x42   : > { %1255 = vmatprep.subr.mxu0 %v710_v17  ;;  %1293 = vmatprep.subr.mxu1 %v821_v18 }
  0x43   : > { %1256 = vmatpush3.msra.mxu0 %v694_v19  ;;  %1294 = vmatpush3.msra.mxu1 %v805_v20 }
  0x44   : > { %1257 = vmatprep.subr.mxu0 %v709_v21  ;;  %1295 = vmatprep.subr.mxu1 %v820_v22 }
  0x45   : > { %1258 = vmatpush3.msra.mxu0 %v693_v23  ;;  %1296 = vmatpush3.msra.mxu1 %v804_v24 }
  0x46   : > { %1259 = vmatprep.subr.mxu0 %v708_v25  ;;  %1297 = vmatprep.subr.mxu1 %v819_v26 }
  0x47   : > { %1260 = vmatpush3.msra.mxu0 %v692_v27  ;;  %1298 = vmatpush3.msra.mxu1 %v803_v28 }
  0x48   : > { %1261 = vmatprep.subr.mxu0 %v707_v29  ;;  %1299 = vmatprep.subr.mxu1 %v818_v30 }
  0x49   : > { %1262 = vmatpush3.msra.mxu0 %v691_v31  ;;  %1300 = vmatpush3.msra.mxu1 %v802_v32 }
  0x4a   : > { %1263 = vmatprep.subr.mxu0 %v706_v33  ;;  %1301 = vmatprep.subr.mxu1 %v817_v34 }
  0x4b   : > { %1264 = vmatpush3.msra.mxu0 %v690_v35  ;;  %1302 = vmatpush3.msra.mxu1 %v801_v36 }
  0xe9   : > { %v592_v37 = vpop.f32.mrf.mxu0  ;;  %v675_v38 = vpop.f32.mrf.mxu1 }
  0xea   : > { %v676_v39 = vadd.f32 %v675_v38, %v592_v37 }
  0xeb   : > { %v594_v40 = vpop.f32.mrf.mxu0  ;;  %v677_v41 = vpop.f32.mrf.mxu1 }
  0xec   : > { %686 = vst [vmem:[%s1919_s21] sm:$0xff] %v676_v39  ;;  %v678_v42 = vadd.f32 %v677_v41, %v594_v40 }
  0xed   : > { %v598_v43 = vpop.f32.mrf.mxu0  ;;  %v681_v44 = vpop.f32.mrf.mxu1 }
  0xee   : > { %687 = vst [vmem:[%s1919_s21 + $0x8] sm:$0xff] %v678_v42  ;;  %v682_v45 = vadd.f32 %v681_v44, %v598_v43  ;;  %786 = vmatprep.mubr.f32.mxu0 %v678_v42  ;;  %897 = vmatprep.mubr.f32.mxu1 %v678_v42 }
  0xef   : > { %v600_v46 = vpop.f32.mrf.mxu0  ;;  %v683_v47 = vpop.f32.mrf.mxu1  ;;  %787 = vmatmul.mubr.f32.vlgmr.msra.gmra.mxu0 %v676_v39  ;;  %898 = vmatmul.mubr.f32.vlgmr.msra.gmra.mxu1 %v676_v39 }
  0xf0   : > { %688 = vst [vmem:[%s1919_s21 + $0x10] sm:$0xff] %v682_v45  ;;  %v684_v48 = vadd.f32 %v683_v47, %v600_v46 }
  0xf2   : > { %689 = vst [vmem:[%s1919_s21 + $0x18] sm:$0xff] %v684_v48  ;;  %791 = vmatprep.mubr.f32.mxu0 %v684_v48  ;;  %902 = vmatprep.mubr.f32.mxu1 %v684_v48  ;;  %s1391_s21 = scalar_lea.vmem %s1390_s12, 1024 }
  0xf3   : > { %792 = vmatmul.mubr.f32.gmra.mxu0 %v682_v45  ;;  %903 = vmatmul.mubr.f32.gmra.mxu1 %v682_v45  ;;  %p1393_p2 = scmp.lt.s32.totalorder %s1391_s21, %s1385_s26 }
  0xf4   : > { %1317 = vmatprep.mubr.msk.f32.mxu0 %vm914_vm1, %v912_v49 }
  0xf5   : > { %p1394_p3 = por %p1393_p2, %p1392_p1 }
  0xf7   : > { %p1395_p5 = pnand %p1394_p3, %p1388_p0 }
 0x1af   : > { %v1303_v50 = vpop.f32.mrf.mxu1 }
 0x1b1   : > { %v1304_v51 = vpop.f32.mrf.mxu1 }
 0x1b2   : > { %v1305_v55 = vadd.f32 %v1304_v51, %v1303_v50 }
 0x1b3   : > { %v1306_v52 = vpop.f32.mrf.mxu1 }
 0x1b4   : > { %v910_v59 = vmul.f32 %v1305_v55, %v908_v57 }
 0x1b5   : > { %v1307_v53 = vpop.f32.mrf.mxu1 }
 0x1b6   : > { %v1308_v56 = vadd.f32 %v1307_v53, %v1306_v52 }
 0x1b8   : > { %v911_v58 = vmul.f32 %v1308_v56, %v909_v54 }
 0x1ba   : > { %1313 = vmatprep.subr.mxu0 %v911_v58 }
 0x1bb   : > { %1314 = vmatpush3.msra.mxu0 %v911_v58 }
 0x1bc   : > { %1315 = vmatprep.subr.mxu0 %v910_v59 }
 0x1bd   : > { %1316 = vmatpush3.msra.mxu0 %v910_v59 }
 0x1be   : > { %1318 = vmatmul.mubr.msk.f32.vlgmr.msra.gmra.mxu0 %vm914_vm1, %v913_v60 }
 0x1bf   : > { %1398 = shalt.err (!%p1395_p5)
}
 0x1c0   : > { %s1399_s19 = scalar_lea.hbm %s1946_s30, 512  ;;  %s1403_s27 = scalar_lea.hbm %s2042_s9, 1024 }
 0x1c1   : > { %p1400_p6 = scmp.ne.s32.totalorder %s1946_s30, %s1399_s19  ;;  %p1404_p10 = scmp.lt.s32.totalorder %s1946_s30, %s2042_s9 }
 0x1c2   : > { %p1405_p11 = scmp.lt.s32.totalorder %s1403_s27, %s1399_s19 }
 0x1c3   : > { %p1401_p7 = pnand %p1400_p6, %p1595_p4 }
 0x1c4   : > { %p1406_p12 = por %p1405_p11, %p1404_p10 }
 0x1c5   : > { %p1402_p9 = pneg %p1401_p7 }
 0x1c7   : > { %p1407_p13 = pnand %p1406_p12, %p1402_p9 }
 0x1c9   : > { %1410 = shalt.err (!%p1407_p13)
}
 0x1ca   : > { %s1495_s26 = smov 256   ;;  %s1496_s12 = smov 16   ;;  %v1265_v61 = vpop.f32.mrf.mxu0  ;;  %v798_v2 = vld [vmem:[%s2040_s7 + $0x8] sm:$0xff]  ;;  %v797_v4 = vld [vmem:[%s2040_s7] sm:$0xff] }
 0x1cb   : > { %1320 = dma.vmem_to_hbm [thread:$0]  (%p1595_p4), %s1940_s29, 512, %s1946_s30, %s1001_s17, %s1495_s26, %s1495_s26, %s1496_s12  }
 0x1cc   : > { %v1266_v62 = vpop.f32.mrf.mxu0  ;;  %s1210_s21 = sshll.u32 %s1916_s24, 4  ;;  %s1232_s29 = sshll.u32 %s1483_s16, 8 }
 0x1cd   : > { %v1267_v3 = vadd.f32 %v1266_v62, %v1265_v61  ;;  %s448_s22 = scalar_lea.vmem [#allocation4], %s1210_s21  ;;  %s1985_s26 = scalar_lea.hbm %s2043_s10, %s1232_s29 }
 0x1ce   : > { %v1268_v63 = vpop.f32.mrf.mxu0  ;;  %s1040_s27 = sshll.u32 %s448_s22, 4  ;;  %s1006_s12 = scalar_lea.sflag [#allocation5], %s1916_s24  ;;  %s1979_s27 = int_to_ptr.vmem [resolvable:$true] %s1040_s27 }
 0x1cf   : > { %v799_v8 = vmul.f32 %v1267_v3, %v797_v4  ;;  %s1411_s16 = scalar_lea.vmem %s1979_s27, 256  ;;  %s1497_s21 = smov [#allocation4]  }
 0x1d0   : > { %v1269_v0 = vpop.f32.mrf.mxu0  ;;  %p1412_p0 = scmp.ne.s32.totalorder %s1979_s27, %s1411_s16  ;;  %s1415_s19 = sshll.u32 %s1497_s21, 4  ;;  %s1416_s19 = int_to_ptr.vmem [resolvable:$false] %s1415_s19 }
 0x1d1   : > { %v1270_v1 = vadd.f32 %v1269_v0, %v1268_v63  ;;  %s1417_s20 = scalar_lea.vmem %s1416_s19, 512  ;;  %p1418_p3 = scmp.lt.s32.totalorder %s1979_s27, %s1416_s19 }
 0x1d2   : > { %p1413_p1 = pnand %p1412_p0, %p1595_p4  ;;  %p1419_p5 = scmp.lt.s32.totalorder %s1417_s20, %s1411_s16 }
 0x1d3   : > { %v800_v5 = vmul.f32 %v1270_v1, %v798_v2 }
 0x1d4   : > { %p1414_p2 = pneg %p1413_p1  ;;  %p1420_p6 = por %p1419_p5, %p1418_p3 }
 0x1d6   : > { %p1421_p7 = pnand %p1420_p6, %p1414_p2 }
 0x27e   : > { %v1319_v6 = vpop.f32.mrf.mxu0 }
 0x27f   : > { %v997_v7 = vadd.f32 %v1319_v6, %v800_v5 }
 0x280   : > { %v987_v9 = vpop.f32.mrf.mxu0 }
 0x281   : > { %999 = vst.msk [vmem:[%s448_s22 + $0x8] sm:$0xff] %vm519_vm0, %v997_v7  ;;  %v996_v10 = vadd.f32 %v987_v9, %v799_v8 }
 0x283   : > { %998 = vst.msk [vmem:[%s448_s22] sm:$0xff] %vm519_vm0, %v996_v10 }
 0x284   : > { %1424 = shalt.err (!%p1421_p7)
}
 0x285   : > { %s1425_s22 = scalar_lea.hbm %s1985_s26, 256  ;;  %s1429_s29 = scalar_lea.hbm %s2043_s10, 512 }
 0x286   : > { %p1426_p9 = scmp.ne.s32.totalorder %s1985_s26, %s1425_s22  ;;  %p1430_p12 = scmp.lt.s32.totalorder %s1985_s26, %s2043_s10 }
 0x287   : > { %p1431_p13 = scmp.lt.s32.totalorder %s1429_s29, %s1425_s22 }
 0x288   : > { %p1427_p10 = pnand %p1426_p9, %p1595_p4 }
 0x289   : > { %p1432_p0 = por %p1431_p13, %p1430_p12 }
 0x28a   : > { %p1428_p11 = pneg %p1427_p10 }
 0x28c   : > { %p1433_p1 = pnand %p1432_p0, %p1428_p11 }
 0x28e   : > { %1436 = shalt.err (!%p1433_p1)
}
 0x28f   : > { %s1498_s16 = smov 128   ;;  %s1499_s21 = smov 8  }
 0x290   : > { %1321 = dma.vmem_to_hbm [thread:$0]  (%p1595_p4), %s1979_s27, 256, %s1985_s26, %s1006_s12, %s1498_s16, %s1498_s16, %s1499_s21  }
 0x291 PF: > { %p1331_p2 = scmp.ge.s32.totalorder %s1491_s18, 2  ;;  %s1055_s19 = sand.u32 1, %s1471_s13  }
 0x292   : > { %s1056_s20 = scalar_lea.sflag [#allocation3], %s1055_s19 }
 0x293   : > { %p1325_p3 = pnand %p1331_p2, %p1602_p8 }
 0x295   : > { %p1326_p5 = pneg %p1325_p3 }
 0x297   : > { %1462 = dma.done.wait (%p1326_p5), %s1056_s20, 512  }
 0x298   : > { %1464 = vsyncadd (%p1326_p5), %s1056_s20, 4294966784  ;;  %s1065_s22 = scalar_lea.sflag [#allocation5], %s1055_s19 }
 0x299   : > { %1466 = dma.done.wait (%p1326_p5), %s1065_s22, 256  }
 0x29a   : > { %1468 = vsyncadd (%p1326_p5), %s1065_s22, 4294967040  ;;  %s27_s18 = sadd.s32 1, %s1491_s18   ;;  %s2051_s23 = sld [smem:[#allocation10_spill]] }
 0x29b   : > { %p24_p6 = scmp.ge.s32.totalorder %s27_s18, 4   ;;  %s2052_s16 = sld [smem:[#allocation8_spill]] }
 0x29c   : > { %s2053_s17 = sld [smem:[#allocation9_spill]]  ;;  %s2054_s13 = smov %s1475_s14 }
 0x29d   : > { %s2055_s14 = smov %s1479_s15  ;;  %26 = sbr.rel (!%p24_p6) target bundleno = 6 (0x6), region = 117 }
 0x2a0   : > { %s2056_s15 = smov %s2051_s23 }
 0x2a2   :  { %1070 = vsyncpa [#allocation3], 1 }
 0x2a3   :  { %1072 = vsyncpa [#allocation3 + $0x1], 1 }
 0x2a4   :  { %1073 = vsyncpa [#allocation5], 1 }
 0x2a5   :  { %1075 = vsyncpa [#allocation5 + $0x1], 1 }

// kernel: tpu_custom_call.1
= control target key start
LH: loop header
LB: loop body
LE: loop exit
PB: predicated region body
PF: predicated region fallthrough
CT: control target
= control target key end

     0   :  { %16 = vsyncpa [#allocation3], 0  ;;  %s2033_s0 = inlined_call_operand.vmem [shape: f32[2,16,64], index: 0, kind: input, shape index: {}]   ;;  %s2034_s1 = inlined_call_operand.vmem [shape: f32[2,16,64], index: 1, kind: input, shape index: {}]   ;;  %s2035_s2 = inlined_call_operand.vmem [shape: f32[64,256], index: 2, kind: input, shape index: {}]   ;;  %s2036_s3 = inlined_call_operand.vmem [shape: f32[64,256], index: 3, kind: input, shape index: {}]   ;;  %s2037_s4 = inlined_call_operand.vmem [shape: f32[256,64], index: 4, kind: input, shape index: {}]   ;;  %s2038_s5 = inlined_call_operand.vmem [shape: f32[256,64], index: 5, kind: input, shape index: {}]   ;;  %s2039_s6 = inlined_call_operand.vmem [shape: f32[16,16], index: 6, kind: input, shape index: {}]   ;;  %s2040_s7 = inlined_call_operand.vmem [shape: f32[16,64], index: 7, kind: input, shape index: {}]   ;;  %s2041_s8 = inlined_call_operand.vmem [shape: f32[16,64], index: 8, kind: input, shape index: {}]   ;;  %s2042_s9 = inlined_call_operand.hbm [shape: f32[2,16,256], index: 9, kind: output, shape index: {0}]   ;;  %s2043_s10 = inlined_call_operand.hbm [shape: f32[2,16,64], index: 10, kind: output, shape index: {1}]  }
   0x1   :  { %18 = vsyncpa [#allocation3 + $0x1], 0 }
   0x2   :  { %19 = vsyncpa [#allocation5], 0 }
   0x3   :  { %21 = vsyncpa [#allocation5 + $0x1], 0  ;;  %s1555_s13 = smov 0   ;;  %s1557_s14 = smov 0  }
   0x4   :  { %s1559_s15 = smov 0   ;;  %s1561_s16 = smov 0  }
   0x5   :  { %s1563_s17 = smov 0   ;;  %s1565_s18 = smov 0  }
   0x6 LB: > { %2046 = sst [smem:[#allocation8_spill]] %s1487_s17  ;;  %s1202_s19 = sadd.s32 4294967295, %s1491_s18   ;;  %s1491_s18 = sphi %s1565_s18, %s27_s18   ;;  %s1487_s17 = sphi %s1563_s17, %s2053_s17   ;;  %s1483_s16 = sphi %s1561_s16, %s2052_s16   ;;  %s1479_s15 = sphi %s1559_s15, %s2056_s15   ;;  %s1475_s14 = sphi %s1557_s14, %s2055_s14   ;;  %s1471_s13 = sphi %s1555_s13, %s2054_s13  }
   0x7   : > { %s1203_s20 = sadd.s32 4294967294, %s1491_s18   ;;  %s39_s21 = sadd.s32 1, %s1487_s17 }
   0x8   : > { %s261_s22 = sadd.s32 1, %s1479_s15  ;;  %p41_p0 = scmp.ge.s32.totalorder %s39_s21, 2 }
   0x9   : > { %p271_p1 = scmp.ne.s32.totalorder %s1479_s15, %s1475_s14  ;;  %p272_p2 = scmp.eq.s32.totalorder %s1202_s19, 1 }
   0xa   : > { %p277_p3 = scmp.ne.s32.totalorder %s1475_s14, %s1471_s13  ;;  %s2058_s21 = smov (%p41_p0, %s39_s21), 0 }
   0xb   : > { %2047 = sst [smem:[#allocation9_spill]] %s2058_s21  ;;  %p1595_p4 = por %p272_p2, %p271_p1 }
   0xc   : > { %p278_p5 = scmp.eq.s32.totalorder %s1203_s20, 1  ;;  %s256_s24 = ssub.s32 %s1487_s17, %s2058_s21 }
   0xd   : > { %p1208_p6 = scmp.ge.s32.totalorder %s1491_s18, 1  ;;  %p259_p7 = scmp.eq.s32.totalorder %s256_s24, 0 }
   0xe   : > { %p1602_p8 = por %p278_p5, %p277_p3  ;;  %p383_p9 = scmp.lt.s32.totalorder %s1491_s18, 3 }
   0xf   : > { %s1608_s26 = scalar_select %p259_p7, %s1479_s15, %s261_s22  }
  0x10   : > { %p384_p10 = pnand %p1208_p6, %p383_p9 }
  0x11   : > { %2050 = sst [smem:[#allocation10_spill]] %s1608_s26  ;;  %p450_p11 = scmp.lt.s32.totalorder (!%p384_p10), %s1483_s16, 1 }
  0x12   : > { %387 = sbr.rel (%p384_p10) target bundleno = 657 (0x291), region = 56  ;;  %s1231_s22 = sshll.u32 (!%p384_p10), %s1483_s16, 9 }
  0x13   : > { %s1946_s30 = scalar_lea.hbm (!%p384_p10), %s2042_s9, %s1231_s22  ;;  %s1494_s11 = smov (!%p384_p10), [#allocation2]  }
  0x14   : > { %s1389_s12 = sshll.u32 (!%p384_p10), %s1494_s11, 4  ;;  %s1390_s12 = int_to_ptr.vmem [resolvable:$false] %s1389_s12 }
  0x17   : > { %v518_v0 = vld [vmem:[%s2036_s3 + $0x78] sm:$0xff]  ;;  %v517_v2 = vld [vmem:[%s2036_s3 + $0x70] sm:$0xff]  ;;  %v516_v4 = vld [vmem:[%s2036_s3 + $0x68] sm:$0xff]  ;;  %s1662_s29 = scalar_select %p450_p11, %s1483_s16, 1  ;;  %vm519_vm0 = vcmask 523264   ;;  %v1493_v34 = vmov 0.0  }
  0x18   : > { %v500_v1 = vld [vmem:[%s2035_s2 + $0x78] sm:$0xff]  ;;  %542 = vmatprep.subr.mxu0 %v518_v0  ;;  %v499_v3 = vld [vmem:[%s2035_s2 + $0x70] sm:$0xff]  ;;  %v498_v5 = vld [vmem:[%s2035_s2 + $0x68] sm:$0xff]  ;;  %590 = vmatprep.mubr.f32.mxu0 %v1493_v34  ;;  %vm914_vm1 = vcmask 130048  }
  0x19   : > { %625 = vmatprep.subr.mxu1 %v500_v1  ;;  %543 = vmatpush1.msra.mxu0 %v517_v2  ;;  %v515_v6 = vld [vmem:[%s2036_s3 + $0x60] sm:$0xff]  ;;  %v514_v8 = vld [vmem:[%s2036_s3 + $0x58] sm:$0xff]  ;;  %v513_v10 = vld [vmem:[%s2036_s3 + $0x50] sm:$0xff]  ;;  %s1229_s24 = sshll.u32 %s1662_s29, 4 }
  0x1a   : > { %626 = vmatpush1.msra.mxu1 %v499_v3  ;;  %v497_v7 = vld [vmem:[%s2035_s2 + $0x60] sm:$0xff]  ;;  %544 = vmatprep.subr.mxu0 %v516_v4  ;;  %v496_v9 = vld [vmem:[%s2035_s2 + $0x58] sm:$0xff]  ;;  %v495_v11 = vld [vmem:[%s2035_s2 + $0x50] sm:$0xff]  ;;  %s467_s17 = scalar_lea.vmem %s2034_s1, %s1229_s24  ;;  %s457_s26 = scalar_lea.vmem %s2033_s0, %s1229_s24 }
  0x1b   : > { %627 = vmatprep.subr.mxu1 %v498_v5  ;;  %545 = vmatpush1.msra.mxu0 %v515_v6  ;;  %v512_v12 = vld [vmem:[%s2036_s3 + $0x48] sm:$0xff]  ;;  %v511_v14 = vld [vmem:[%s2036_s3 + $0x40] sm:$0xff]  ;;  %v510_v16 = vld [vmem:[%s2036_s3 + $0x38] sm:$0xff]  ;;  %s1916_s24 = sand.u32 1, %s1475_s14  }
  0x1c   : > { %628 = vmatpush1.msra.mxu1 %v497_v7  ;;  %v494_v13 = vld [vmem:[%s2035_s2 + $0x48] sm:$0xff]  ;;  %546 = vmatprep.subr.mxu0 %v514_v8  ;;  %v493_v15 = vld [vmem:[%s2035_s2 + $0x40] sm:$0xff]  ;;  %v492_v17 = vld [vmem:[%s2035_s2 + $0x38] sm:$0xff]  ;;  %s1209_s27 = sshll.u32 %s1916_s24, 5 }
  0x1d   : > { %629 = vmatprep.subr.mxu1 %v496_v9  ;;  %547 = vmatpush1.msra.mxu0 %v513_v10  ;;  %v509_v18 = vld [vmem:[%s2036_s3 + $0x30] sm:$0xff]  ;;  %v508_v20 = vld [vmem:[%s2036_s3 + $0x28] sm:$0xff]  ;;  %v507_v22 = vld [vmem:[%s2036_s3 + $0x20] sm:$0xff]  ;;  %s1919_s21 = scalar_lea.vmem [#allocation2], %s1209_s27 }
  0x1e   : > { %630 = vmatpush1.msra.mxu1 %v495_v11  ;;  %548 = vmatprep.subr.mxu0 %v512_v12  ;;  %v491_v19 = vld [vmem:[%s2035_s2 + $0x30] sm:$0xff]  ;;  %v490_v21 = vld [vmem:[%s2035_s2 + $0x28] sm:$0xff]  ;;  %v489_v23 = vld [vmem:[%s2035_s2 + $0x20] sm:$0xff]  ;;  %s1022_s29 = sshll.u32 %s1919_s21, 4  ;;  %s1940_s29 = int_to_ptr.vmem [resolvable:$true] %s1022_s29 }
  0x1f   : > { %631 = vmatprep.subr.mxu1 %v494_v13  ;;  %549 = vmatpush1.msra.mxu0 %v511_v14  ;;  %v506_v24 = vld [vmem:[%s2036_s3 + $0x18] sm:$0xff]  ;;  %v505_v26 = vld [vmem:[%s2036_s3 + $0x10] sm:$0xff]  ;;  %v504_v28 = vld [vmem:[%s2036_s3 + $0x8] sm:$0xff]  ;;  %p1392_p1 = scmp.lt.s32.totalorder %s1940_s29, %s1390_s12 }
  0x20   : > { %632 = vmatpush1.msra.mxu1 %v493_v15  ;;  %550 = vmatprep.subr.mxu0 %v510_v16  ;;  %v488_v25 = vld [vmem:[%s2035_s2 + $0x18] sm:$0xff]  ;;  %v487_v27 = vld [vmem:[%s2035_s2 + $0x10] sm:$0xff]  ;;  %v486_v29 = vld [vmem:[%s2035_s2 + $0x8] sm:$0xff] }
  0x21   : > { %633 = vmatprep.subr.mxu1 %v492_v17  ;;  %551 = vmatpush1.msra.mxu0 %v509_v18  ;;  %v503_v30 = vld [vmem:[%s2036_s3] sm:$0xff]  ;;  %v721_v35 = vld [vmem:[%s2037_s4 + $0xf8] sm:$0xff]  ;;  %v502_v39 = vld [vmem:[%s467_s17 + $0x8] sm:$0xff] }
  0x22   : > { %634 = vmatpush1.msra.mxu1 %v491_v19  ;;  %552 = vmatprep.subr.mxu0 %v508_v20  ;;  %v485_v31 = vld [vmem:[%s2035_s2] sm:$0xff]  ;;  %v832_v36 = vld [vmem:[%s2038_s5 + $0xf8] sm:$0xff]  ;;  %v484_v40 = vld [vmem:[%s457_s26 + $0x8] sm:$0xff] }
  0x23   : > { %635 = vmatprep.subr.mxu1 %v490_v21  ;;  %553 = vmatpush1.msra.mxu0 %v507_v22  ;;  %v501_v32 = vld [vmem:[%s467_s17] sm:$0xff]  ;;  %v705_v37 = vld [vmem:[%s2037_s4 + $0x78] sm:$0xff]  ;;  %v720_v41 = vld [vmem:[%s2037_s4 + $0xf0] sm:$0xff]  ;;  %s1001_s17 = scalar_lea.sflag [#allocation3], %s1916_s24 }
  0x24   : > { %636 = vmatpush1.msra.mxu1 %v489_v23  ;;  %554 = vmatprep.subr.mxu0 %v506_v24  ;;  %v483_v33 = vld [vmem:[%s457_s26] sm:$0xff]  ;;  %v816_v38 = vld [vmem:[%s2038_s5 + $0x78] sm:$0xff]  ;;  %v831_v42 = vld [vmem:[%s2038_s5 + $0xf0] sm:$0xff]  ;;  %s1385_s26 = scalar_lea.vmem %s1940_s29, 512 }
  0x25   : > { %637 = vmatprep.subr.mxu1 %v488_v25  ;;  %555 = vmatpush1.msra.mxu0 %v505_v26  ;;  %v704_v43 = vld [vmem:[%s2037_s4 + $0x70] sm:$0xff]  ;;  %v719_v45 = vld [vmem:[%s2037_s4 + $0xe8] sm:$0xff]  ;;  %v718_v49 = vld [vmem:[%s2037_s4 + $0xe0] sm:$0xff]  ;;  %p1386_p12 = scmp.ne.s32.totalorder %s1940_s29, %s1385_s26 }
  0x26   : > { %638 = vmatpush1.msra.mxu1 %v487_v27  ;;  %556 = vmatprep.subr.mxu0 %v504_v28  ;;  %v815_v44 = vld [vmem:[%s2038_s5 + $0x70] sm:$0xff]  ;;  %v830_v46 = vld [vmem:[%s2038_s5 + $0xe8] sm:$0xff]  ;;  %v829_v50 = vld [vmem:[%s2038_s5 + $0xe0] sm:$0xff] }
  0x27   : > { %639 = vmatprep.subr.mxu1 %v486_v29  ;;  %557 = vmatpush1.msra.mxu0 %v503_v30  ;;  %v703_v47 = vld [vmem:[%s2037_s4 + $0x68] sm:$0xff]  ;;  %v702_v51 = vld [vmem:[%s2037_s4 + $0x60] sm:$0xff]  ;;  %v717_v53 = vld [vmem:[%s2037_s4 + $0xd8] sm:$0xff]  ;;  %p1387_p13 = pnand %p1386_p12, %p1595_p4 }
  0x28   : > { %640 = vmatpush1.msra.mxu1 %v485_v31  ;;  %673 = vmatprep.mubr.f32.mxu1 %v1493_v34  ;;  %v814_v48 = vld [vmem:[%s2038_s5 + $0x68] sm:$0xff]  ;;  %v813_v52 = vld [vmem:[%s2038_s5 + $0x60] sm:$0xff]  ;;  %v828_v54 = vld [vmem:[%s2038_s5 + $0xd8] sm:$0xff] }
  0x29   : > { %1215 = vmatmul.mubr.msk.f32.vlgmr.msra.gmra.mxu0 %vm519_vm0, %v501_v32  ;;  %1217 = vmatmul.mubr.msk.f32.vlgmr.msra.gmra.mxu1 %vm519_vm0, %v483_v33  ;;  %v701_v55 = vld [vmem:[%s2037_s4 + $0x58] sm:$0xff]  ;;  %v716_v57 = vld [vmem:[%s2037_s4 + $0xd0] sm:$0xff]  ;;  %v715_v61 = vld [vmem:[%s2037_s4 + $0xc8] sm:$0xff]  ;;  %p1388_p0 = pneg %p1387_p13 }
  0x2a   : > { %596 = vmatprep.mubr.f32.mxu0 %v1493_v34  ;;  %679 = vmatprep.mubr.f32.mxu1 %v1493_v34  ;;  %v812_v56 = vld [vmem:[%s2038_s5 + $0x58] sm:$0xff]  ;;  %v827_v58 = vld [vmem:[%s2038_s5 + $0xd0] sm:$0xff]  ;;  %v826_v62 = vld [vmem:[%s2038_s5 + $0xc8] sm:$0xff] }
  0x2b   : > { %1233 = vmatprep.subr.mxu0 %v721_v35  ;;  %1271 = vmatprep.subr.mxu1 %v832_v36  ;;  %v700_v59 = vld [vmem:[%s2037_s4 + $0x50] sm:$0xff]  ;;  %v699_v63 = vld [vmem:[%s2037_s4 + $0x48] sm:$0xff]  ;;  %v714_v1 = vld [vmem:[%s2037_s4 + $0xc0] sm:$0xff] }
  0x2c   : > { %1234 = vmatpush3.msra.mxu0 %v705_v37  ;;  %1272 = vmatpush3.msra.mxu1 %v816_v38  ;;  %v811_v60 = vld [vmem:[%s2038_s5 + $0x50] sm:$0xff]  ;;  %v810_v0 = vld [vmem:[%s2038_s5 + $0x48] sm:$0xff]  ;;  %v825_v2 = vld [vmem:[%s2038_s5 + $0xc0] sm:$0xff] }
  0x2d   : > { %1216 = vmatmul.mubr.msk.f32.gmra.mxu0 %vm519_vm0, %v502_v39  ;;  %1218 = vmatmul.mubr.msk.f32.gmra.mxu1 %vm519_vm0, %v484_v40  ;;  %v698_v3 = vld [vmem:[%s2037_s4 + $0x40] sm:$0xff]  ;;  %v713_v5 = vld [vmem:[%s2037_s4 + $0xb8] sm:$0xff]  ;;  %v712_v9 = vld [vmem:[%s2037_s4 + $0xb0] sm:$0xff] }
  0x2e   : > { %1235 = vmatprep.subr.mxu0 %v720_v41  ;;  %1273 = vmatprep.subr.mxu1 %v831_v42  ;;  %v809_v4 = vld [vmem:[%s2038_s5 + $0x40] sm:$0xff]  ;;  %v824_v6 = vld [vmem:[%s2038_s5 + $0xb8] sm:$0xff]  ;;  %v823_v10 = vld [vmem:[%s2038_s5 + $0xb0] sm:$0xff] }
  0x2f   : > { %1236 = vmatpush3.msra.mxu0 %v704_v43  ;;  %1274 = vmatpush3.msra.mxu1 %v815_v44  ;;  %v697_v7 = vld [vmem:[%s2037_s4 + $0x38] sm:$0xff]  ;;  %v696_v11 = vld [vmem:[%s2037_s4 + $0x30] sm:$0xff]  ;;  %v711_v13 = vld [vmem:[%s2037_s4 + $0xa8] sm:$0xff] }
  0x30   : > { %1237 = vmatprep.subr.mxu0 %v719_v45  ;;  %1275 = vmatprep.subr.mxu1 %v830_v46  ;;  %v808_v8 = vld [vmem:[%s2038_s5 + $0x38] sm:$0xff]  ;;  %v807_v12 = vld [vmem:[%s2038_s5 + $0x30] sm:$0xff]  ;;  %v822_v14 = vld [vmem:[%s2038_s5 + $0xa8] sm:$0xff] }
  0x31   : > { %1238 = vmatpush3.msra.mxu0 %v703_v47  ;;  %1276 = vmatpush3.msra.mxu1 %v814_v48  ;;  %v695_v15 = vld [vmem:[%s2037_s4 + $0x28] sm:$0xff]  ;;  %v710_v17 = vld [vmem:[%s2037_s4 + $0xa0] sm:$0xff]  ;;  %v709_v21 = vld [vmem:[%s2037_s4 + $0x98] sm:$0xff] }
  0x32   : > { %1239 = vmatprep.subr.mxu0 %v718_v49  ;;  %1277 = vmatprep.subr.mxu1 %v829_v50  ;;  %v806_v16 = vld [vmem:[%s2038_s5 + $0x28] sm:$0xff]  ;;  %v821_v18 = vld [vmem:[%s2038_s5 + $0xa0] sm:$0xff]  ;;  %v820_v22 = vld [vmem:[%s2038_s5 + $0x98] sm:$0xff] }
  0x33   : > { %1240 = vmatpush3.msra.mxu0 %v702_v51  ;;  %1278 = vmatpush3.msra.mxu1 %v813_v52  ;;  %v694_v19 = vld [vmem:[%s2037_s4 + $0x20] sm:$0xff]  ;;  %v693_v23 = vld [vmem:[%s2037_s4 + $0x18] sm:$0xff]  ;;  %v708_v25 = vld [vmem:[%s2037_s4 + $0x90] sm:$0xff] }
  0x34   : > { %1241 = vmatprep.subr.mxu0 %v717_v53  ;;  %1279 = vmatprep.subr.mxu1 %v828_v54  ;;  %v805_v20 = vld [vmem:[%s2038_s5 + $0x20] sm:$0xff]  ;;  %v804_v24 = vld [vmem:[%s2038_s5 + $0x18] sm:$0xff]  ;;  %v819_v26 = vld [vmem:[%s2038_s5 + $0x90] sm:$0xff] }
  0x35   : > { %1242 = vmatpush3.msra.mxu0 %v701_v55  ;;  %1280 = vmatpush3.msra.mxu1 %v812_v56  ;;  %v692_v27 = vld [vmem:[%s2037_s4 + $0x10] sm:$0xff]  ;;  %v707_v29 = vld [vmem:[%s2037_s4 + $0x88] sm:$0xff]  ;;  %v706_v33 = vld [vmem:[%s2037_s4 + $0x80] sm:$0xff] }
  0x36   : > { %1243 = vmatprep.subr.mxu0 %v716_v57  ;;  %1281 = vmatprep.subr.mxu1 %v827_v58  ;;  %v803_v28 = vld [vmem:[%s2038_s5 + $0x10] sm:$0xff]  ;;  %v818_v30 = vld [vmem:[%s2038_s5 + $0x88] sm:$0xff]  ;;  %v817_v34 = vld [vmem:[%s2038_s5 + $0x80] sm:$0xff] }
  0x37   : > { %1244 = vmatpush3.msra.mxu0 %v700_v59  ;;  %1282 = vmatpush3.msra.mxu1 %v811_v60  ;;  %v691_v31 = vld [vmem:[%s2037_s4 + $0x8] sm:$0xff]  ;;  %v690_v35 = vld [vmem:[%s2037_s4] sm:$0xff] }
  0x38   : > { %1245 = vmatprep.subr.mxu0 %v715_v61  ;;  %1283 = vmatprep.subr.mxu1 %v826_v62  ;;  %v802_v32 = vld [vmem:[%s2038_s5 + $0x8] sm:$0xff]  ;;  %v801_v36 = vld [vmem:[%s2038_s5] sm:$0xff] }
  0x39   : > { %1246 = vmatpush3.msra.mxu0 %v699_v63  ;;  %1284 = vmatpush3.msra.mxu1 %v810_v0  ;;  %v912_v49 = vld [vmem:[%s2039_s6] sm:$0xff]  ;;  %v909_v54 = vld [vmem:[%s2041_s8 + $0x8] sm:$0xff] }
  0x3a   : > { %1247 = vmatprep.subr.mxu0 %v714_v1  ;;  %1285 = vmatprep.subr.mxu1 %v825_v2  ;;  %v908_v57 = vld [vmem:[%s2041_s8] sm:$0xff]  ;;  %v913_v60 = vld [vmem:[%s2039_s6 + $0x8] sm:$0xff] }
  0x3b   : > { %1248 = vmatpush3.msra.mxu0 %v698_v3  ;;  %1286 = vmatpush3.msra.mxu1 %v809_v4 }
  0x3c   : > { %1249 = vmatprep.subr.mxu0 %v713_v5  ;;  %1287 = vmatprep.subr.mxu1 %v824_v6 }
  0x3d   : > { %1250 = vmatpush3.msra.mxu0 %v697_v7  ;;  %1288 = vmatpush3.msra.mxu1 %v808_v8 }
  0x3e   : > { %1251 = vmatprep.subr.mxu0 %v712_v9  ;;  %1289 = vmatprep.subr.mxu1 %v823_v10 }
  0x3f   : > { %1252 = vmatpush3.msra.mxu0 %v696_v11  ;;  %1290 = vmatpush3.msra.mxu1 %v807_v12 }
  0x40   : > { %1253 = vmatprep.subr.mxu0 %v711_v13  ;;  %1291 = vmatprep.subr.mxu1 %v822_v14 }
  0x41   : > { %1254 = vmatpush3.msra.mxu0 %v695_v15  ;;  %1292 = vmatpush3.msra.mxu1 %v806_v16 }
  0x42   : > { %1255 = vmatprep.subr.mxu0 %v710_v17  ;;  %1293 = vmatprep.subr.mxu1 %v821_v18 }
  0x43   : > { %1256 = vmatpush3.msra.mxu0 %v694_v19  ;;  %1294 = vmatpush3.msra.mxu1 %v805_v20 }
  0x44   : > { %1257 = vmatprep.subr.mxu0 %v709_v21  ;;  %1295 = vmatprep.subr.mxu1 %v820_v22 }
  0x45   : > { %1258 = vmatpush3.msra.mxu0 %v693_v23  ;;  %1296 = vmatpush3.msra.mxu1 %v804_v24 }
  0x46   : > { %1259 = vmatprep.subr.mxu0 %v708_v25  ;;  %1297 = vmatprep.subr.mxu1 %v819_v26 }
  0x47   : > { %1260 = vmatpush3.msra.mxu0 %v692_v27  ;;  %1298 = vmatpush3.msra.mxu1 %v803_v28 }
  0x48   : > { %1261 = vmatprep.subr.mxu0 %v707_v29  ;;  %1299 = vmatprep.subr.mxu1 %v818_v30 }
  0x49   : > { %1262 = vmatpush3.msra.mxu0 %v691_v31  ;;  %1300 = vmatpush3.msra.mxu1 %v802_v32 }
  0x4a   : > { %1263 = vmatprep.subr.mxu0 %v706_v33  ;;  %1301 = vmatprep.subr.mxu1 %v817_v34 }
  0x4b   : > { %1264 = vmatpush3.msra.mxu0 %v690_v35  ;;  %1302 = vmatpush3.msra.mxu1 %v801_v36 }
  0xe9   : > { %v592_v37 = vpop.f32.mrf.mxu0  ;;  %v675_v38 = vpop.f32.mrf.mxu1 }
  0xea   : > { %v676_v39 = vadd.f32 %v675_v38, %v592_v37 }
  0xeb   : > { %v594_v40 = vpop.f32.mrf.mxu0  ;;  %v677_v41 = vpop.f32.mrf.mxu1 }
  0xec   : > { %686 = vst [vmem:[%s1919_s21] sm:$0xff] %v676_v39  ;;  %v678_v42 = vadd.f32 %v677_v41, %v594_v40 }
  0xed   : > { %v598_v43 = vpop.f32.mrf.mxu0  ;;  %v681_v44 = vpop.f32.mrf.mxu1 }
  0xee   : > { %687 = vst [vmem:[%s1919_s21 + $0x8] sm:$0xff] %v678_v42  ;;  %v682_v45 = vadd.f32 %v681_v44, %v598_v43  ;;  %786 = vmatprep.mubr.f32.mxu0 %v678_v42  ;;  %897 = vmatprep.mubr.f32.mxu1 %v678_v42 }
  0xef   : > { %v600_v46 = vpop.f32.mrf.mxu0  ;;  %v683_v47 = vpop.f32.mrf.mxu1  ;;  %787 = vmatmul.mubr.f32.vlgmr.msra.gmra.mxu0 %v676_v39  ;;  %898 = vmatmul.mubr.f32.vlgmr.msra.gmra.mxu1 %v676_v39 }
  0xf0   : > { %688 = vst [vmem:[%s1919_s21 + $0x10] sm:$0xff] %v682_v45  ;;  %v684_v48 = vadd.f32 %v683_v47, %v600_v46 }
  0xf2   : > { %689 = vst [vmem:[%s1919_s21 + $0x18] sm:$0xff] %v684_v48  ;;  %791 = vmatprep.mubr.f32.mxu0 %v684_v48  ;;  %902 = vmatprep.mubr.f32.mxu1 %v684_v48  ;;  %s1391_s21 = scalar_lea.vmem %s1390_s12, 1024 }
  0xf3   : > { %792 = vmatmul.mubr.f32.gmra.mxu0 %v682_v45  ;;  %903 = vmatmul.mubr.f32.gmra.mxu1 %v682_v45  ;;  %p1393_p2 = scmp.lt.s32.totalorder %s1391_s21, %s1385_s26 }
  0xf4   : > { %1317 = vmatprep.mubr.msk.f32.mxu0 %vm914_vm1, %v912_v49 }
  0xf5   : > { %p1394_p3 = por %p1393_p2, %p1392_p1 }
  0xf7   : > { %p1395_p5 = pnand %p1394_p3, %p1388_p0 }
 0x1af   : > { %v1303_v50 = vpop.f32.mrf.mxu1 }
 0x1b1   : > { %v1304_v51 = vpop.f32.mrf.mxu1 }
 0x1b2   : > { %v1305_v55 = vadd.f32 %v1304_v51, %v1303_v50 }
 0x1b3   : > { %v1306_v52 = vpop.f32.mrf.mxu1 }
 0x1b4   : > { %v910_v59 = vmul.f32 %v1305_v55, %v908_v57 }
 0x1b5   : > { %v1307_v53 = vpop.f32.mrf.mxu1 }
 0x1b6   : > { %v1308_v56 = vadd.f32 %v1307_v53, %v1306_v52 }
 0x1b8   : > { %v911_v58 = vmul.f32 %v1308_v56, %v909_v54 }
 0x1ba   : > { %1313 = vmatprep.subr.mxu0 %v911_v58 }
 0x1bb   : > { %1314 = vmatpush3.msra.mxu0 %v911_v58 }
 0x1bc   : > { %1315 = vmatprep.subr.mxu0 %v910_v59 }
 0x1bd   : > { %1316 = vmatpush3.msra.mxu0 %v910_v59 }
 0x1be   : > { %1318 = vmatmul.mubr.msk.f32.vlgmr.msra.gmra.mxu0 %vm914_vm1, %v913_v60 }
 0x1bf   : > { %1398 = shalt.err (!%p1395_p5)
}
 0x1c0   : > { %s1399_s19 = scalar_lea.hbm %s1946_s30, 512  ;;  %s1403_s27 = scalar_lea.hbm %s2042_s9, 1024 }
 0x1c1   : > { %p1400_p6 = scmp.ne.s32.totalorder %s1946_s30, %s1399_s19  ;;  %p1404_p10 = scmp.lt.s32.totalorder %s1946_s30, %s2042_s9 }
 0x1c2   : > { %p1405_p11 = scmp.lt.s32.totalorder %s1403_s27, %s1399_s19 }
 0x1c3   : > { %p1401_p7 = pnand %p1400_p6, %p1595_p4 }
 0x1c4   : > { %p1406_p12 = por %p1405_p11, %p1404_p10 }
 0x1c5   : > { %p1402_p9 = pneg %p1401_p7 }
 0x1c7   : > { %p1407_p13 = pnand %p1406_p12, %p1402_p9 }
 0x1c9   : > { %1410 = shalt.err (!%p1407_p13)
}
 0x1ca   : > { %s1495_s26 = smov 256   ;;  %s1496_s12 = smov 16   ;;  %v1265_v61 = vpop.f32.mrf.mxu0  ;;  %v798_v2 = vld [vmem:[%s2040_s7 + $0x8] sm:$0xff]  ;;  %v797_v4 = vld [vmem:[%s2040_s7] sm:$0xff] }
 0x1cb   : > { %1320 = dma.vmem_to_hbm [thread:$0]  (%p1595_p4), %s1940_s29, 512, %s1946_s30, %s1001_s17, %s1495_s26, %s1495_s26, %s1496_s12  }
 0x1cc   : > { %v1266_v62 = vpop.f32.mrf.mxu0  ;;  %s1210_s21 = sshll.u32 %s1916_s24, 4  ;;  %s1232_s29 = sshll.u32 %s1483_s16, 8 }
 0x1cd   : > { %v1267_v3 = vadd.f32 %v1266_v62, %v1265_v61  ;;  %s448_s22 = scalar_lea.vmem [#allocation4], %s1210_s21  ;;  %s1985_s26 = scalar_lea.hbm %s2043_s10, %s1232_s29 }
 0x1ce   : > { %v1268_v63 = vpop.f32.mrf.mxu0  ;;  %s1040_s27 = sshll.u32 %s448_s22, 4  ;;  %s1006_s12 = scalar_lea.sflag [#allocation5], %s1916_s24  ;;  %s1979_s27 = int_to_ptr.vmem [resolvable:$true] %s1040_s27 }
 0x1cf   : > { %v799_v8 = vmul.f32 %v1267_v3, %v797_v4  ;;  %s1411_s16 = scalar_lea.vmem %s1979_s27, 256  ;;  %s1497_s21 = smov [#allocation4]  }
 0x1d0   : > { %v1269_v0 = vpop.f32.mrf.mxu0  ;;  %p1412_p0 = scmp.ne.s32.totalorder %s1979_s27, %s1411_s16  ;;  %s1415_s19 = sshll.u32 %s1497_s21, 4  ;;  %s1416_s19 = int_to_ptr.vmem [resolvable:$false] %s1415_s19 }
 0x1d1   : > { %v1270_v1 = vadd.f32 %v1269_v0, %v1268_v63  ;;  %s1417_s20 = scalar_lea.vmem %s1416_s19, 512  ;;  %p1418_p3 = scmp.lt.s32.totalorder %s1979_s27, %s1416_s19 }
 0x1d2   : > { %p1413_p1 = pnand %p1412_p0, %p1595_p4  ;;  %p1419_p5 = scmp.lt.s32.totalorder %s1417_s20, %s1411_s16 }
 0x1d3   : > { %v800_v5 = vmul.f32 %v1270_v1, %v798_v2 }
 0x1d4   : > { %p1414_p2 = pneg %p1413_p1  ;;  %p1420_p6 = por %p1419_p5, %p1418_p3 }
 0x1d6   : > { %p1421_p7 = pnand %p1420_p6, %p1414_p2 }
 0x27e   : > { %v1319_v6 = vpop.f32.mrf.mxu0 }
 0x27f   : > { %v997_v7 = vadd.f32 %v1319_v6, %v800_v5 }
 0x280   : > { %v987_v9 = vpop.f32.mrf.mxu0 }
 0x281   : > { %999 = vst.msk [vmem:[%s448_s22 + $0x8] sm:$0xff] %vm519_vm0, %v997_v7  ;;  %v996_v10 = vadd.f32 %v987_v9, %v799_v8 }
 0x283   : > { %998 = vst.msk [vmem:[%s448_s22] sm:$0xff] %vm519_vm0, %v996_v10 }
 0x284   : > { %1424 = shalt.err (!%p1421_p7)
}
 0x285   : > { %s1425_s22 = scalar_lea.hbm %s1985_s26, 256  ;;  %s1429_s29 = scalar_lea.hbm %s2043_s10, 512 }
 0x286   : > { %p1426_p9 = scmp.ne.s32.totalorder %s1985_s26, %s1425_s22  ;;  %p1430_p12 = scmp.lt.s32.totalorder %s1985_s26, %s2043_s10 }
 0x287   : > { %p1431_p13 = scmp.lt.s32.totalorder %s1429_s29, %s1425_s22 }
 0x288   : > { %p1427_p10 = pnand %p1426_p9, %p1595_p4 }
 0x289   : > { %p1432_p0 = por %p1431_p13, %p1430_p12 }
 0x28a   : > { %p1428_p11 = pneg %p1427_p10 }
 0x28c   : > { %p1433_p1 = pnand %p1432_p0, %p1428_p11 }
 0x28e   : > { %1436 = shalt.err (!%p1433_p1)
}
 0x28f   : > { %s1498_s16 = smov 128   ;;  %s1499_s21 = smov 8  }
 0x290   : > { %1321 = dma.vmem_to_hbm [thread:$0]  (%p1595_p4), %s1979_s27, 256, %s1985_s26, %s1006_s12, %s1498_s16, %s1498_s16, %s1499_s21  }
 0x291 PF: > { %p1331_p2 = scmp.ge.s32.totalorder %s1491_s18, 2  ;;  %s1055_s19 = sand.u32 1, %s1471_s13  }
 0x292   : > { %s1056_s20 = scalar_lea.sflag [#allocation3], %s1055_s19 }
 0x293   : > { %p1325_p3 = pnand %p1331_p2, %p1602_p8 }
 0x295   : > { %p1326_p5 = pneg %p1325_p3 }
 0x297   : > { %1462 = dma.done.wait (%p1326_p5), %s1056_s20, 512  }
 0x298   : > { %1464 = vsyncadd (%p1326_p5), %s1056_s20, 4294966784  ;;  %s1065_s22 = scalar_lea.sflag [#allocation5], %s1055_s19 }
 0x299   : > { %1466 = dma.done.wait (%p1326_p5), %s1065_s22, 256  }
 0x29a   : > { %1468 = vsyncadd (%p1326_p5), %s1065_s22, 4294967040  ;;  %s27_s18 = sadd.s32 1, %s1491_s18   ;;  %s2051_s23 = sld [smem:[#allocation10_spill]] }
 0x29b   : > { %p24_p6 = scmp.ge.s32.totalorder %s27_s18, 4   ;;  %s2052_s16 = sld [smem:[#allocation8_spill]] }
 0x29c   : > { %s2053_s17 = sld [smem:[#allocation9_spill]]  ;;  %s2054_s13 = smov %s1475_s14 }
 0x29d   : > { %s2055_s14 = smov %s1479_s15  ;;  %26 = sbr.rel (!%p24_p6) target bundleno = 6 (0x6), region = 117 }
 0x2a0   : > { %s2056_s15 = smov %s2051_s23 }
 0x2a2   :  { %1070 = vsyncpa [#allocation3], 1 }
 0x2a3   :  { %1072 = vsyncpa [#allocation3 + $0x1], 1 }
 0x2a4   :  { %1073 = vsyncpa [#allocation5], 1 }
 0x2a5   :  { %1075 = vsyncpa [#allocation5 + $0x1], 1 }

</bundles_post_ra>
